<compile_context>
chip_gen: v5e
topology: v5e:2x2
jax: 0.10.0
libtpu: 0.0.40
codegen_flags: <defaults>
</compile_context>

<pallas_src>
import jax
import jax.numpy as jnp
from jax import lax
from jax.experimental import pallas as pl
from jax.experimental.pallas import tpu as pltpu

# ---- synthetic DistilBERT-like config (small) ----
VOCAB = 50
MAX_POS = 16
HIDDEN = 32
N_HEADS = 4
HEAD_DIM = HIDDEN // N_HEADS
FFN = 64
N_LAYERS = 2
N_CLASSES = 2
LN_EPS = 1e-12

# ---- packed-small-parameter layout: one row per tiny tensor, 128 lanes wide ----
SMALL_W = 128
ROW_EMB_G = 0
ROW_EMB_B = 1
LAYER_ROW_BASE = 2
ROWS_PER_LAYER = 8          # [bqkv, bo, ln1_g, ln1_b, b1, b2, ln2_g, ln2_b]
ROW_FC_INT = LAYER_ROW_BASE + N_LAYERS * ROWS_PER_LAYER
ROW_FC_B = ROW_FC_INT + 1
N_SMALL_ROWS = ROW_FC_B + 1


# --------------------------- in-kernel helpers ---------------------------
def _layernorm(x, gamma, beta, eps=LN_EPS):
    mu = jnp.mean(x, axis=-1, keepdims=True)
    xc = x - mu
    var = jnp.mean(xc * xc, axis=-1, keepdims=True)
    return xc * lax.rsqrt(var + eps) * gamma + beta


def _softmax_lastdim(x):
    m = jnp.max(x, axis=-1, keepdims=True)
    e = jnp.exp(x - m)
    # approx reciprocal goes to the (otherwise idle) EUP slot instead of the VPU
    return e * pl.reciprocal(jnp.sum(e, axis=-1, keepdims=True), approx=True)


# --------------------------- fused forward kernel (one sample per grid step) -------------
def fused_forward_kernel(
    ids_ref, mask_ref, inten_ref,
    word_emb_ref, pos_emb_ref, wqkv_ref, wo_ref, w1_ref, w2_ref,
    fc_wcls_ref, small_ref,
    out_ref,
):
    S = ids_ref.shape[0]
    scale = HEAD_DIM ** -0.5

    def srow(r, w):
        # one packed small parameter: static (1, w) slice, broadcasts over (S, w)
        return small_ref[r:r + 1, 0:w]

    # ---- embedding lookup (one-hot MXU matmul; fine at VOCAB=50) + pos emb + LayerNorm ----
    ids = ids_ref[...]                                                 # (S, 1) int32
    vocab_iota = lax.broadcasted_iota(jnp.int32, (S, VOCAB), 1)
    onehot = (ids == vocab_iota).astype(jnp.float32)                   # (S, VOCAB)
    we = jnp.dot(onehot, word_emb_ref[...], preferred_element_type=jnp.float32)
    x = _layernorm(we + pos_emb_ref[0:S, :],
                   srow(ROW_EMB_G, HIDDEN), srow(ROW_EMB_B, HIDDEN))   # (S, H)

    # ---- additive attention-mask bias, hoisted out of the layer loop ----
    maskf = mask_ref[...].reshape(1, S).astype(jnp.float32)
    bias = jnp.broadcast_to(((1.0 - maskf) * (-1e9)).reshape(1, 1, S),
                            (N_HEADS, 1, S))                           # (NH, 1, S)

    # ---- encoder layers (static loop; L=2 so all weights stay VMEM-resident) ----
    # TODO(synk): move to a layer grid axis / fori_loop with streamed weights when L grows.
    for l in range(N_LAYERS):
        base = LAYER_ROW_BASE + l * ROWS_PER_LAYER

        # fused QKV projection: ONE (S,H)@(H,3H) matmul + one bias add
        qkv = (jnp.dot(x, wqkv_ref[l], preferred_element_type=jnp.float32)
               + srow(base + 0, 3 * HIDDEN))                           # (S, 3H)

        # split heads onto a leading (batched-matmul) axis via static lane slices
        def heads(off):
            return jnp.stack(
                [qkv[:, off + h * HEAD_DIM: off + (h + 1) * HEAD_DIM]
                 for h in range(N_HEADS)], axis=0)                     # (NH, S, HD)
        q_n, k_n, v_n = heads(0), heads(HIDDEN), heads(2 * HIDDEN)

        s = jnp.einsum('nqd,nkd->nqk', q_n, k_n,
                       preferred_element_type=jnp.float32) * scale + bias
        p = _softmax_lastdim(s)                                        # (NH, S, S)
        ctx = jnp.einsum('nqk,nkd->nqd', p, v_n,
                         preferred_element_type=jnp.float32)           # (NH, S, HD)

        # merge heads back lane-contiguously (head-major) -> ONE (S,H)@(H,H) output projection
        ctx2 = jnp.concatenate([ctx[h] for h in range(N_HEADS)], axis=-1)   # (S, H)
        attn = (jnp.dot(ctx2, wo_ref[l], preferred_element_type=jnp.float32)
                + srow(base + 1, HIDDEN))
        x = _layernorm(x + attn, srow(base + 2, HIDDEN), srow(base + 3, HIDDEN))

        # FFN
        h1 = jnp.dot(x, w1_ref[l], preferred_element_type=jnp.float32) + srow(base + 4, FFN)
        # TODO(synk): DistilBERT uses exact (erf) GELU; tanh approximation used here.
        h1 = jax.nn.gelu(h1, approximate=True)
        ffn = jnp.dot(h1, w2_ref[l], preferred_element_type=jnp.float32) + srow(base + 5, HIDDEN)
        x = _layernorm(x + ffn, srow(base + 6, HIDDEN), srow(base + 7, HIDDEN))

    # ---- [CLS] pooling (dropout == identity in eval) + concat(intensity) + Linear ----
    cls = x[0:1, :]                                                    # (1, H)
    inten = inten_ref[...].reshape(1, 1)                               # (1, 1)
    logits = (jnp.dot(cls, fc_wcls_ref[...], preferred_element_type=jnp.float32)
              + inten * srow(ROW_FC_INT, N_CLASSES)   # (1,1)*(1,2) == inten @ w_int
              + srow(ROW_FC_B, N_CLASSES))
    out_ref[...] = logits.reshape(1, 1, N_CLASSES)


# --------------------------- parameters ---------------------------
def init_params(key):
    keys = jax.random.split(key, 10)

    def dense(k, shape, scale=0.02):
        return scale * jax.random.normal(k, shape, jnp.float32)

    L, H = N_LAYERS, HIDDEN
    return {
        'word_emb': dense(keys[0], (VOCAB, H)),
        'pos_emb': dense(keys[1], (MAX_POS, H)),
        'emb_gamma': jnp.ones((H,), jnp.float32),
        'emb_beta': jnp.zeros((H,), jnp.float32),
        'wq': dense(keys[2], (L, H, H)), 'bq': jnp.zeros((L, H), jnp.float32),
        'wk': dense(keys[3], (L, H, H)), 'bk': jnp.zeros((L, H), jnp.float32),
        'wv': dense(keys[4], (L, H, H)), 'bv': jnp.zeros((L, H), jnp.float32),
        'wo': dense(keys[5], (L, H, H)), 'bo': jnp.zeros((L, H), jnp.float32),
        'ln1_g': jnp.ones((L, H), jnp.float32), 'ln1_b': jnp.zeros((L, H), jnp.float32),
        'w1': dense(keys[6], (L, H, FFN)), 'b1': jnp.zeros((L, FFN), jnp.float32),
        'w2': dense(keys[7], (L, FFN, H)), 'b2': jnp.zeros((L, H), jnp.float32),
        'ln2_g': jnp.ones((L, H), jnp.float32), 'ln2_b': jnp.zeros((L, H), jnp.float32),
        'fc_w_cls': dense(keys[8], (H, N_CLASSES)),    # [CLS]-feature rows of fc weight
        'fc_w_int': dense(keys[9], (1, N_CLASSES)),    # intensity row of fc weight
        'fc_b': jnp.zeros((N_CLASSES,), jnp.float32),
    }


def pack_params(p):
    """Fuse QKV weights and pack every tiny tensor into one (N_SMALL_ROWS, SMALL_W) array."""
    # (L, H, 3H); within each of q/k/v the output axis is head-major (matches torch head split)
    wqkv = jnp.concatenate([p['wq'], p['wk'], p['wv']], axis=-1)

    def row(v):
        v = jnp.asarray(v, jnp.float32).reshape(-1)
        return jnp.pad(v, (0, SMALL_W - v.shape[0]))

    rows = [row(p['emb_gamma']), row(p['emb_beta'])]
    for l in range(N_LAYERS):
        rows += [
            row(jnp.concatenate([p['bq'][l], p['bk'][l], p['bv'][l]])),   # bqkv
            row(p['bo'][l]),
            row(p['ln1_g'][l]), row(p['ln1_b'][l]),
            row(p['b1'][l]), row(p['b2'][l]),
            row(p['ln2_g'][l]), row(p['ln2_b'][l]),
        ]
    rows += [row(p['fc_w_int']), row(p['fc_b'])]
    small = jnp.stack(rows)
    assert small.shape == (N_SMALL_ROWS, SMALL_W)
    return (p['word_emb'], p['pos_emb'], wqkv, p['wo'], p['w1'], p['w2'],
            p['fc_w_cls'], small)


# --------------------------- forward (single pallas_call, batch grid) ---------------------------
def fake_news_classifier_forward(params, input_ids, attention_mask, intensities):
    B, S = input_ids.shape
    ids2 = input_ids.reshape(B * S, 1).astype(jnp.int32)     # per-sample (S, 1) blocks
    mask3 = attention_mask.reshape(B, 1, S).astype(jnp.int32)
    inten3 = intensities.reshape(B, 1, 1).astype(jnp.float32)
    weights = pack_params(params)

    # weights: full-array VMEM-resident blocks (constant index map across the batch grid)
    def full(a):
        return pl.BlockSpec(a.shape, lambda b, _nd=a.ndim: (0,) * _nd)

    out3 = pl.pallas_call(
        fused_forward_kernel,
        out_shape=jax.ShapeDtypeStruct((B, 1, N_CLASSES), jnp.float32),
        grid=(B,),
        in_specs=[
            pl.BlockSpec((S, 1), lambda b: (b, 0)),          # input ids
            pl.BlockSpec((1, 1, S), lambda b: (b, 0, 0)),    # attention mask
            pl.BlockSpec((1, 1, 1), lambda b: (b, 0, 0)),    # intensity
        ] + [full(w) for w in weights],
        out_specs=pl.BlockSpec((1, 1, N_CLASSES), lambda b: (b, 0, 0)),
        compiler_params=pltpu.CompilerParams(
            dimension_semantics=("parallel",)),              # v7x: one sample per TensorCore
    )(ids2, mask3, inten3, *weights)
    return out3.reshape(B, N_CLASSES)


if __name__ == "__main__":
    key = jax.random.PRNGKey(0)
    pkey, ikey, tkey = jax.random.split(key, 3)
    params = init_params(pkey)

    B, S = 2, 8
    input_ids = jax.random.randint(ikey, (B, S), 0, VOCAB)
    attention_mask = jnp.ones((B, S), jnp.int32).at[1, 6:].set(0)  # pad last 2 of sample 1
    intensities = jax.random.uniform(tkey, (B, 1), jnp.float32)

    logits = fake_news_classifier_forward(params, input_ids, attention_mask, intensities)
    logits = jax.block_until_ready(logits)
    assert logits.shape == (B, N_CLASSES) and logits.dtype == jnp.float32
    assert bool(jnp.all(jnp.isfinite(logits)))
    print("KERNEL_OK")
</pallas_src>

<mosaic_0001>
module attributes {stable_mosaic.version = 11 : i64} {
  func.func @fused_forward_kernel(%arg0: i32, %arg1: memref<8x1xi32, #tpu.memory_space<vmem>>, %arg2: memref<1x1x8xi32, #tpu.memory_space<vmem>>, %arg3: memref<1x1x1xf32, #tpu.memory_space<vmem>>, %arg4: memref<50x32xf32, #tpu.memory_space<vmem>>, %arg5: memref<16x32xf32, #tpu.memory_space<vmem>>, %arg6: memref<2x32x96xf32, #tpu.memory_space<vmem>>, %arg7: memref<2x32x32xf32, #tpu.memory_space<vmem>>, %arg8: memref<2x32x64xf32, #tpu.memory_space<vmem>>, %arg9: memref<2x64x32xf32, #tpu.memory_space<vmem>>, %arg10: memref<32x2xf32, #tpu.memory_space<vmem>>, %arg11: memref<20x128xf32, #tpu.memory_space<vmem>>, %arg12: memref<1x1x2xf32, #tpu.memory_space<vmem>>) attributes {dimension_semantics = [#tpu.dimension_semantics<parallel>], iteration_bounds = array<i64: 2>, scalar_prefetch = 0 : i64, scratch_operands = 0 : i64, tpu.core_type = #tpu.core_type<tc>, window_params = [{transform_indices = @transform_0, window_bounds = array<i64: 8, 1>}, {transform_indices = @transform_1, window_bounds = array<i64: 1, 1, 8>}, {transform_indices = @transform_2, window_bounds = array<i64: 1, 1, 1>}, {pipeline_mode = #tpu.pipeline_mode<synchronous>, transform_indices = @transform_3, window_bounds = array<i64: 50, 32>}, {pipeline_mode = #tpu.pipeline_mode<synchronous>, transform_indices = @transform_4, window_bounds = array<i64: 16, 32>}, {pipeline_mode = #tpu.pipeline_mode<synchronous>, transform_indices = @transform_5, window_bounds = array<i64: 2, 32, 96>}, {pipeline_mode = #tpu.pipeline_mode<synchronous>, transform_indices = @transform_6, window_bounds = array<i64: 2, 32, 32>}, {pipeline_mode = #tpu.pipeline_mode<synchronous>, transform_indices = @transform_7, window_bounds = array<i64: 2, 32, 64>}, {pipeline_mode = #tpu.pipeline_mode<synchronous>, transform_indices = @transform_8, window_bounds = array<i64: 2, 64, 32>}, {pipeline_mode = #tpu.pipeline_mode<synchronous>, transform_indices = @transform_9, window_bounds = array<i64: 32, 2>}, {pipeline_mode = #tpu.pipeline_mode<synchronous>, transform_indices = @transform_10, window_bounds = array<i64: 20, 128>}, {transform_indices = @transform_11, window_bounds = array<i64: 1, 1, 2>}]} {
    %c0 = arith.constant 0 : index
    %c0_0 = arith.constant 0 : index
    %0 = vector.load %arg1[%c0, %c0_0] : memref<8x1xi32, #tpu.memory_space<vmem>>, vector<8x1xi32>
    %1 = tpu.iota {dimensions = array<i32: 1>} : vector<8x50xi32>
    %2 = vector.broadcast %0 : vector<8x1xi32> to vector<8x50xi32>
    %3 = arith.cmpi eq, %2, %1 : vector<8x50xi32>
    %4 = arith.extui %3 : vector<8x50xi1> to vector<8x50xi32>
    %5 = arith.sitofp %4 : vector<8x50xi32> to vector<8x50xf32>
    %c0_1 = arith.constant 0 : index
    %c0_2 = arith.constant 0 : index
    %6 = vector.load %arg4[%c0_1, %c0_2] : memref<50x32xf32, #tpu.memory_space<vmem>>, vector<50x32xf32>
    %cst = arith.constant dense<0.000000e+00> : vector<8x32xf32>
    %7 = tpu.matmul %5, %6, %cst {dimension_numbers = #tpu.dot_dimension_numbers<[1], [0], [0], [1], [0, 0, 1, 1], [], []>} : vector<8x50xf32>, vector<50x32xf32>, vector<8x32xf32> -> vector<8x32xf32>
    %c0_3 = arith.constant 0 : index
    %c0_4 = arith.constant 0 : index
    %8 = vector.load %arg5[%c0_3, %c0_4] : memref<16x32xf32, #tpu.memory_space<vmem>>, vector<8x32xf32>
    %9 = arith.addf %7, %8 : vector<8x32xf32>
    %c0_5 = arith.constant 0 : index
    %c0_6 = arith.constant 0 : index
    %10 = vector.load %arg11[%c0_5, %c0_6] : memref<20x128xf32, #tpu.memory_space<vmem>>, vector<1x32xf32>
    %c1 = arith.constant 1 : index
    %c0_7 = arith.constant 0 : index
    %11 = vector.load %arg11[%c1, %c0_7] : memref<20x128xf32, #tpu.memory_space<vmem>>, vector<1x32xf32>
    %cst_8 = arith.constant dense<0.000000e+00> : vector<8xf32>
    %12 = vector.multi_reduction <add>, %9, %cst_8 [1] : vector<8x32xf32> to vector<8xf32>
    %13 = vector.shape_cast %12 : vector<8xf32> to vector<8x1xf32>
    %cst_9 = arith.constant 3.200000e+01 : f32
    %14 = vector.broadcast %cst_9 : f32 to vector<8x1xf32>
    %15 = arith.divf %13, %14 : vector<8x1xf32>
    %16 = vector.broadcast %15 : vector<8x1xf32> to vector<8x32xf32>
    %17 = arith.subf %9, %16 : vector<8x32xf32>
    %18 = arith.mulf %17, %17 : vector<8x32xf32>
    %cst_10 = arith.constant dense<0.000000e+00> : vector<8xf32>
    %19 = vector.multi_reduction <add>, %18, %cst_10 [1] : vector<8x32xf32> to vector<8xf32>
    %20 = vector.shape_cast %19 : vector<8xf32> to vector<8x1xf32>
    %cst_11 = arith.constant 3.200000e+01 : f32
    %21 = vector.broadcast %cst_11 : f32 to vector<8x1xf32>
    %22 = arith.divf %20, %21 : vector<8x1xf32>
    %cst_12 = arith.constant 9.99999996E-13 : f32
    %23 = vector.broadcast %cst_12 : f32 to vector<8x1xf32>
    %24 = arith.addf %22, %23 : vector<8x1xf32>
    %25 = math.rsqrt %24 : vector<8x1xf32>
    %26 = vector.broadcast %25 : vector<8x1xf32> to vector<8x32xf32>
    %27 = arith.mulf %17, %26 : vector<8x32xf32>
    %28 = vector.broadcast %10 : vector<1x32xf32> to vector<8x32xf32>
    %29 = arith.mulf %27, %28 : vector<8x32xf32>
    %30 = vector.broadcast %11 : vector<1x32xf32> to vector<8x32xf32>
    %31 = arith.addf %29, %30 : vector<8x32xf32>
    %c0_13 = arith.constant 0 : index
    %c0_14 = arith.constant 0 : index
    %c0_15 = arith.constant 0 : index
    %32 = vector.load %arg2[%c0_13, %c0_14, %c0_15] : memref<1x1x8xi32, #tpu.memory_space<vmem>>, vector<1x1x8xi32>
    %33 = vector.shape_cast %32 : vector<1x1x8xi32> to vector<1x8xi32>
    %34 = arith.sitofp %33 : vector<1x8xi32> to vector<1x8xf32>
    %cst_16 = arith.constant 1.000000e+00 : f32
    %35 = vector.broadcast %cst_16 : f32 to vector<1x8xf32>
    %36 = arith.subf %35, %34 : vector<1x8xf32>
    %cst_17 = arith.constant -1.000000e+09 : f32
    %37 = vector.broadcast %cst_17 : f32 to vector<1x8xf32>
    %38 = arith.mulf %36, %37 : vector<1x8xf32>
    %39 = vector.shape_cast %38 : vector<1x8xf32> to vector<1x1x8xf32>
    %40 = vector.shape_cast %39 : vector<1x1x8xf32> to vector<1x1x8xf32>
    %41 = vector.broadcast %40 : vector<1x1x8xf32> to vector<4x1x8xf32>
    %c0_18 = arith.constant 0 : index
    %c0_19 = arith.constant 0 : index
    %c0_20 = arith.constant 0 : index
    %42 = vector.load %arg6[%c0_18, %c0_19, %c0_20] : memref<2x32x96xf32, #tpu.memory_space<vmem>>, vector<1x32x96xf32>
    %43 = vector.shape_cast %42 : vector<1x32x96xf32> to vector<32x96xf32>
    %cst_21 = arith.constant dense<0.000000e+00> : vector<8x96xf32>
    %44 = tpu.matmul %31, %43, %cst_21 {dimension_numbers = #tpu.dot_dimension_numbers<[1], [0], [0], [1], [0, 0, 1, 1], [], []>} : vector<8x32xf32>, vector<32x96xf32>, vector<8x96xf32> -> vector<8x96xf32>
    %c2 = arith.constant 2 : index
    %c0_22 = arith.constant 0 : index
    %45 = vector.load %arg11[%c2, %c0_22] : memref<20x128xf32, #tpu.memory_space<vmem>>, vector<1x96xf32>
    %46 = vector.broadcast %45 : vector<1x96xf32> to vector<8x96xf32>
    %47 = arith.addf %44, %46 : vector<8x96xf32>
    %48 = vector.extract_strided_slice %47 {offsets = [0, 0], sizes = [8, 8], strides = [1, 1]} : vector<8x96xf32> to vector<8x8xf32>
    %49 = vector.extract_strided_slice %47 {offsets = [0, 8], sizes = [8, 8], strides = [1, 1]} : vector<8x96xf32> to vector<8x8xf32>
    %50 = vector.extract_strided_slice %47 {offsets = [0, 16], sizes = [8, 8], strides = [1, 1]} : vector<8x96xf32> to vector<8x8xf32>
    %51 = vector.extract_strided_slice %47 {offsets = [0, 24], sizes = [8, 8], strides = [1, 1]} : vector<8x96xf32> to vector<8x8xf32>
    %52 = vector.shape_cast %48 : vector<8x8xf32> to vector<1x8x8xf32>
    %53 = vector.shape_cast %49 : vector<8x8xf32> to vector<1x8x8xf32>
    %54 = vector.shape_cast %50 : vector<8x8xf32> to vector<1x8x8xf32>
    %55 = vector.shape_cast %51 : vector<8x8xf32> to vector<1x8x8xf32>
    %56 = tpu.concatenate %52, %53, %54, %55 in 0 : vector<1x8x8xf32>, vector<1x8x8xf32>, vector<1x8x8xf32>, vector<1x8x8xf32> -> vector<4x8x8xf32>
    %57 = vector.extract_strided_slice %47 {offsets = [0, 32], sizes = [8, 8], strides = [1, 1]} : vector<8x96xf32> to vector<8x8xf32>
    %58 = vector.extract_strided_slice %47 {offsets = [0, 40], sizes = [8, 8], strides = [1, 1]} : vector<8x96xf32> to vector<8x8xf32>
    %59 = vector.extract_strided_slice %47 {offsets = [0, 48], sizes = [8, 8], strides = [1, 1]} : vector<8x96xf32> to vector<8x8xf32>
    %60 = vector.extract_strided_slice %47 {offsets = [0, 56], sizes = [8, 8], strides = [1, 1]} : vector<8x96xf32> to vector<8x8xf32>
    %61 = vector.shape_cast %57 : vector<8x8xf32> to vector<1x8x8xf32>
    %62 = vector.shape_cast %58 : vector<8x8xf32> to vector<1x8x8xf32>
    %63 = vector.shape_cast %59 : vector<8x8xf32> to vector<1x8x8xf32>
    %64 = vector.shape_cast %60 : vector<8x8xf32> to vector<1x8x8xf32>
    %65 = tpu.concatenate %61, %62, %63, %64 in 0 : vector<1x8x8xf32>, vector<1x8x8xf32>, vector<1x8x8xf32>, vector<1x8x8xf32> -> vector<4x8x8xf32>
    %66 = vector.extract_strided_slice %47 {offsets = [0, 64], sizes = [8, 8], strides = [1, 1]} : vector<8x96xf32> to vector<8x8xf32>
    %67 = vector.extract_strided_slice %47 {offsets = [0, 72], sizes = [8, 8], strides = [1, 1]} : vector<8x96xf32> to vector<8x8xf32>
    %68 = vector.extract_strided_slice %47 {offsets = [0, 80], sizes = [8, 8], strides = [1, 1]} : vector<8x96xf32> to vector<8x8xf32>
    %69 = vector.extract_strided_slice %47 {offsets = [0, 88], sizes = [8, 8], strides = [1, 1]} : vector<8x96xf32> to vector<8x8xf32>
    %70 = vector.shape_cast %66 : vector<8x8xf32> to vector<1x8x8xf32>
    %71 = vector.shape_cast %67 : vector<8x8xf32> to vector<1x8x8xf32>
    %72 = vector.shape_cast %68 : vector<8x8xf32> to vector<1x8x8xf32>
    %73 = vector.shape_cast %69 : vector<8x8xf32> to vector<1x8x8xf32>
    %74 = tpu.concatenate %70, %71, %72, %73 in 0 : vector<1x8x8xf32>, vector<1x8x8xf32>, vector<1x8x8xf32>, vector<1x8x8xf32> -> vector<4x8x8xf32>
    "tpu.trace_start"() <{level = 10 : i32, message = "nqd,nkd->nqk"}> : () -> ()
    %cst_23 = arith.constant dense<0.000000e+00> : vector<4x8x8xf32>
    %75 = tpu.matmul %56, %65, %cst_23 {dimension_numbers = #tpu.dot_dimension_numbers<[2], [2], [1], [1], [0, 0, 0, 1, 1, 1], [0], [0]>} : vector<4x8x8xf32>, vector<4x8x8xf32>, vector<4x8x8xf32> -> vector<4x8x8xf32>
    "tpu.trace_stop"() : () -> ()
    %cst_24 = arith.constant 0.353553385 : f32
    %76 = vector.broadcast %cst_24 : f32 to vector<4x8x8xf32>
    %77 = arith.mulf %75, %76 : vector<4x8x8xf32>
    %78 = vector.broadcast %41 : vector<4x1x8xf32> to vector<4x8x8xf32>
    %79 = arith.addf %77, %78 : vector<4x8x8xf32>
    %cst_25 = arith.constant dense<0xFF800000> : vector<4x8xf32>
    %80 = vector.multi_reduction <maximumf>, %79, %cst_25 [2] : vector<4x8x8xf32> to vector<4x8xf32>
    %81 = vector.shape_cast %80 : vector<4x8xf32> to vector<4x8x1xf32>
    %82 = vector.broadcast %81 : vector<4x8x1xf32> to vector<4x8x8xf32>
    %83 = arith.subf %79, %82 : vector<4x8x8xf32>
    %84 = math.exp %83 : vector<4x8x8xf32>
    %cst_26 = arith.constant dense<0.000000e+00> : vector<4x8xf32>
    %85 = vector.multi_reduction <add>, %84, %cst_26 [2] : vector<4x8x8xf32> to vector<4x8xf32>
    %86 = vector.shape_cast %85 : vector<4x8xf32> to vector<4x8x1xf32>
    %87 = tpu.reciprocal %86 {approx = true} : vector<4x8x1xf32> -> vector<4x8x1xf32>
    %88 = vector.broadcast %87 : vector<4x8x1xf32> to vector<4x8x8xf32>
    %89 = arith.mulf %84, %88 : vector<4x8x8xf32>
    "tpu.trace_start"() <{level = 10 : i32, message = "nqk,nkd->nqd"}> : () -> ()
    %cst_27 = arith.constant dense<0.000000e+00> : vector<4x8x8xf32>
    %90 = tpu.matmul %89, %74, %cst_27 {dimension_numbers = #tpu.dot_dimension_numbers<[2], [1], [1], [2], [0, 0, 0, 1, 1, 2], [0], [0]>} : vector<4x8x8xf32>, vector<4x8x8xf32>, vector<4x8x8xf32> -> vector<4x8x8xf32>
    "tpu.trace_stop"() : () -> ()
    %91 = vector.extract_strided_slice %90 {offsets = [0, 0, 0], sizes = [1, 8, 8], strides = [1, 1, 1]} : vector<4x8x8xf32> to vector<1x8x8xf32>
    %92 = vector.shape_cast %91 : vector<1x8x8xf32> to vector<8x8xf32>
    %93 = vector.extract_strided_slice %90 {offsets = [1, 0, 0], sizes = [1, 8, 8], strides = [1, 1, 1]} : vector<4x8x8xf32> to vector<1x8x8xf32>
    %94 = vector.shape_cast %93 : vector<1x8x8xf32> to vector<8x8xf32>
    %95 = vector.extract_strided_slice %90 {offsets = [2, 0, 0], sizes = [1, 8, 8], strides = [1, 1, 1]} : vector<4x8x8xf32> to vector<1x8x8xf32>
    %96 = vector.shape_cast %95 : vector<1x8x8xf32> to vector<8x8xf32>
    %97 = vector.extract_strided_slice %90 {offsets = [3, 0, 0], sizes = [1, 8, 8], strides = [1, 1, 1]} : vector<4x8x8xf32> to vector<1x8x8xf32>
    %98 = vector.shape_cast %97 : vector<1x8x8xf32> to vector<8x8xf32>
    %99 = tpu.concatenate %92, %94, %96, %98 in 1 : vector<8x8xf32>, vector<8x8xf32>, vector<8x8xf32>, vector<8x8xf32> -> vector<8x32xf32>
    %c0_28 = arith.constant 0 : index
    %c0_29 = arith.constant 0 : index
    %c0_30 = arith.constant 0 : index
    %100 = vector.load %arg7[%c0_28, %c0_29, %c0_30] : memref<2x32x32xf32, #tpu.memory_space<vmem>>, vector<1x32x32xf32>
    %101 = vector.shape_cast %100 : vector<1x32x32xf32> to vector<32x32xf32>
    %cst_31 = arith.constant dense<0.000000e+00> : vector<8x32xf32>
    %102 = tpu.matmul %99, %101, %cst_31 {dimension_numbers = #tpu.dot_dimension_numbers<[1], [0], [0], [1], [0, 0, 1, 1], [], []>} : vector<8x32xf32>, vector<32x32xf32>, vector<8x32xf32> -> vector<8x32xf32>
    %c3 = arith.constant 3 : index
    %c0_32 = arith.constant 0 : index
    %103 = vector.load %arg11[%c3, %c0_32] : memref<20x128xf32, #tpu.memory_space<vmem>>, vector<1x32xf32>
    %104 = vector.broadcast %103 : vector<1x32xf32> to vector<8x32xf32>
    %105 = arith.addf %102, %104 : vector<8x32xf32>
    %106 = arith.addf %31, %105 : vector<8x32xf32>
    %c4 = arith.constant 4 : index
    %c0_33 = arith.constant 0 : index
    %107 = vector.load %arg11[%c4, %c0_33] : memref<20x128xf32, #tpu.memory_space<vmem>>, vector<1x32xf32>
    %c5 = arith.constant 5 : index
    %c0_34 = arith.constant 0 : index
    %108 = vector.load %arg11[%c5, %c0_34] : memref<20x128xf32, #tpu.memory_space<vmem>>, vector<1x32xf32>
    %cst_35 = arith.constant dense<0.000000e+00> : vector<8xf32>
    %109 = vector.multi_reduction <add>, %106, %cst_35 [1] : vector<8x32xf32> to vector<8xf32>
    %110 = vector.shape_cast %109 : vector<8xf32> to vector<8x1xf32>
    %cst_36 = arith.constant 3.200000e+01 : f32
    %111 = vector.broadcast %cst_36 : f32 to vector<8x1xf32>
    %112 = arith.divf %110, %111 : vector<8x1xf32>
    %113 = vector.broadcast %112 : vector<8x1xf32> to vector<8x32xf32>
    %114 = arith.subf %106, %113 : vector<8x32xf32>
    %115 = arith.mulf %114, %114 : vector<8x32xf32>
    %cst_37 = arith.constant dense<0.000000e+00> : vector<8xf32>
    %116 = vector.multi_reduction <add>, %115, %cst_37 [1] : vector<8x32xf32> to vector<8xf32>
    %117 = vector.shape_cast %116 : vector<8xf32> to vector<8x1xf32>
    %cst_38 = arith.constant 3.200000e+01 : f32
    %118 = vector.broadcast %cst_38 : f32 to vector<8x1xf32>
    %119 = arith.divf %117, %118 : vector<8x1xf32>
    %cst_39 = arith.constant 9.99999996E-13 : f32
    %120 = vector.broadcast %cst_39 : f32 to vector<8x1xf32>
    %121 = arith.addf %119, %120 : vector<8x1xf32>
    %122 = math.rsqrt %121 : vector<8x1xf32>
    %123 = vector.broadcast %122 : vector<8x1xf32> to vector<8x32xf32>
    %124 = arith.mulf %114, %123 : vector<8x32xf32>
    %125 = vector.broadcast %107 : vector<1x32xf32> to vector<8x32xf32>
    %126 = arith.mulf %124, %125 : vector<8x32xf32>
    %127 = vector.broadcast %108 : vector<1x32xf32> to vector<8x32xf32>
    %128 = arith.addf %126, %127 : vector<8x32xf32>
    %c0_40 = arith.constant 0 : index
    %c0_41 = arith.constant 0 : index
    %c0_42 = arith.constant 0 : index
    %129 = vector.load %arg8[%c0_40, %c0_41, %c0_42] : memref<2x32x64xf32, #tpu.memory_space<vmem>>, vector<1x32x64xf32>
    %130 = vector.shape_cast %129 : vector<1x32x64xf32> to vector<32x64xf32>
    %cst_43 = arith.constant dense<0.000000e+00> : vector<8x64xf32>
    %131 = tpu.matmul %128, %130, %cst_43 {dimension_numbers = #tpu.dot_dimension_numbers<[1], [0], [0], [1], [0, 0, 1, 1], [], []>} : vector<8x32xf32>, vector<32x64xf32>, vector<8x64xf32> -> vector<8x64xf32>
    %c6 = arith.constant 6 : index
    %c0_44 = arith.constant 0 : index
    %132 = vector.load %arg11[%c6, %c0_44] : memref<20x128xf32, #tpu.memory_space<vmem>>, vector<1x64xf32>
    %133 = vector.broadcast %132 : vector<1x64xf32> to vector<8x64xf32>
    %134 = arith.addf %131, %133 : vector<8x64xf32>
    %135 = arith.mulf %134, %134 : vector<8x64xf32>
    %136 = arith.mulf %134, %135 : vector<8x64xf32>
    %cst_45 = arith.constant 4.471500e-02 : f32
    %137 = vector.broadcast %cst_45 : f32 to vector<8x64xf32>
    %138 = arith.mulf %137, %136 : vector<8x64xf32>
    %139 = arith.addf %134, %138 : vector<8x64xf32>
    %cst_46 = arith.constant 0.797884583 : f32
    %140 = vector.broadcast %cst_46 : f32 to vector<8x64xf32>
    %141 = arith.mulf %140, %139 : vector<8x64xf32>
    %142 = math.tanh %141 : vector<8x64xf32>
    %cst_47 = arith.constant 1.000000e+00 : f32
    %143 = vector.broadcast %cst_47 : f32 to vector<8x64xf32>
    %144 = arith.addf %143, %142 : vector<8x64xf32>
    %cst_48 = arith.constant 5.000000e-01 : f32
    %145 = vector.broadcast %cst_48 : f32 to vector<8x64xf32>
    %146 = arith.mulf %145, %144 : vector<8x64xf32>
    %147 = arith.mulf %134, %146 : vector<8x64xf32>
    %c0_49 = arith.constant 0 : index
    %c0_50 = arith.constant 0 : index
    %c0_51 = arith.constant 0 : index
    %148 = vector.load %arg9[%c0_49, %c0_50, %c0_51] : memref<2x64x32xf32, #tpu.memory_space<vmem>>, vector<1x64x32xf32>
    %149 = vector.shape_cast %148 : vector<1x64x32xf32> to vector<64x32xf32>
    %cst_52 = arith.constant dense<0.000000e+00> : vector<8x32xf32>
    %150 = tpu.matmul %147, %149, %cst_52 {dimension_numbers = #tpu.dot_dimension_numbers<[1], [0], [0], [1], [0, 0, 1, 1], [], []>} : vector<8x64xf32>, vector<64x32xf32>, vector<8x32xf32> -> vector<8x32xf32>
    %c7 = arith.constant 7 : index
    %c0_53 = arith.constant 0 : index
    %151 = vector.load %arg11[%c7, %c0_53] : memref<20x128xf32, #tpu.memory_space<vmem>>, vector<1x32xf32>
    %152 = vector.broadcast %151 : vector<1x32xf32> to vector<8x32xf32>
    %153 = arith.addf %150, %152 : vector<8x32xf32>
    %154 = arith.addf %128, %153 : vector<8x32xf32>
    %c8 = arith.constant 8 : index
    %c0_54 = arith.constant 0 : index
    %155 = vector.load %arg11[%c8, %c0_54] : memref<20x128xf32, #tpu.memory_space<vmem>>, vector<1x32xf32>
    %c9 = arith.constant 9 : index
    %c0_55 = arith.constant 0 : index
    %156 = vector.load %arg11[%c9, %c0_55] : memref<20x128xf32, #tpu.memory_space<vmem>>, vector<1x32xf32>
    %cst_56 = arith.constant dense<0.000000e+00> : vector<8xf32>
    %157 = vector.multi_reduction <add>, %154, %cst_56 [1] : vector<8x32xf32> to vector<8xf32>
    %158 = vector.shape_cast %157 : vector<8xf32> to vector<8x1xf32>
    %cst_57 = arith.constant 3.200000e+01 : f32
    %159 = vector.broadcast %cst_57 : f32 to vector<8x1xf32>
    %160 = arith.divf %158, %159 : vector<8x1xf32>
    %161 = vector.broadcast %160 : vector<8x1xf32> to vector<8x32xf32>
    %162 = arith.subf %154, %161 : vector<8x32xf32>
    %163 = arith.mulf %162, %162 : vector<8x32xf32>
    %cst_58 = arith.constant dense<0.000000e+00> : vector<8xf32>
    %164 = vector.multi_reduction <add>, %163, %cst_58 [1] : vector<8x32xf32> to vector<8xf32>
    %165 = vector.shape_cast %164 : vector<8xf32> to vector<8x1xf32>
    %cst_59 = arith.constant 3.200000e+01 : f32
    %166 = vector.broadcast %cst_59 : f32 to vector<8x1xf32>
    %167 = arith.divf %165, %166 : vector<8x1xf32>
    %cst_60 = arith.constant 9.99999996E-13 : f32
    %168 = vector.broadcast %cst_60 : f32 to vector<8x1xf32>
    %169 = arith.addf %167, %168 : vector<8x1xf32>
    %170 = math.rsqrt %169 : vector<8x1xf32>
    %171 = vector.broadcast %170 : vector<8x1xf32> to vector<8x32xf32>
    %172 = arith.mulf %162, %171 : vector<8x32xf32>
    %173 = vector.broadcast %155 : vector<1x32xf32> to vector<8x32xf32>
    %174 = arith.mulf %172, %173 : vector<8x32xf32>
    %175 = vector.broadcast %156 : vector<1x32xf32> to vector<8x32xf32>
    %176 = arith.addf %174, %175 : vector<8x32xf32>
    %c1_61 = arith.constant 1 : index
    %c0_62 = arith.constant 0 : index
    %c0_63 = arith.constant 0 : index
    %177 = vector.load %arg6[%c1_61, %c0_62, %c0_63] : memref<2x32x96xf32, #tpu.memory_space<vmem>>, vector<1x32x96xf32>
    %178 = vector.shape_cast %177 : vector<1x32x96xf32> to vector<32x96xf32>
    %cst_64 = arith.constant dense<0.000000e+00> : vector<8x96xf32>
    %179 = tpu.matmul %176, %178, %cst_64 {dimension_numbers = #tpu.dot_dimension_numbers<[1], [0], [0], [1], [0, 0, 1, 1], [], []>} : vector<8x32xf32>, vector<32x96xf32>, vector<8x96xf32> -> vector<8x96xf32>
    %c10 = arith.constant 10 : index
    %c0_65 = arith.constant 0 : index
    %180 = vector.load %arg11[%c10, %c0_65] : memref<20x128xf32, #tpu.memory_space<vmem>>, vector<1x96xf32>
    %181 = vector.broadcast %180 : vector<1x96xf32> to vector<8x96xf32>
    %182 = arith.addf %179, %181 : vector<8x96xf32>
    %183 = vector.extract_strided_slice %182 {offsets = [0, 0], sizes = [8, 8], strides = [1, 1]} : vector<8x96xf32> to vector<8x8xf32>
    %184 = vector.extract_strided_slice %182 {offsets = [0, 8], sizes = [8, 8], strides = [1, 1]} : vector<8x96xf32> to vector<8x8xf32>
    %185 = vector.extract_strided_slice %182 {offsets = [0, 16], sizes = [8, 8], strides = [1, 1]} : vector<8x96xf32> to vector<8x8xf32>
    %186 = vector.extract_strided_slice %182 {offsets = [0, 24], sizes = [8, 8], strides = [1, 1]} : vector<8x96xf32> to vector<8x8xf32>
    %187 = vector.shape_cast %183 : vector<8x8xf32> to vector<1x8x8xf32>
    %188 = vector.shape_cast %184 : vector<8x8xf32> to vector<1x8x8xf32>
    %189 = vector.shape_cast %185 : vector<8x8xf32> to vector<1x8x8xf32>
    %190 = vector.shape_cast %186 : vector<8x8xf32> to vector<1x8x8xf32>
    %191 = tpu.concatenate %187, %188, %189, %190 in 0 : vector<1x8x8xf32>, vector<1x8x8xf32>, vector<1x8x8xf32>, vector<1x8x8xf32> -> vector<4x8x8xf32>
    %192 = vector.extract_strided_slice %182 {offsets = [0, 32], sizes = [8, 8], strides = [1, 1]} : vector<8x96xf32> to vector<8x8xf32>
    %193 = vector.extract_strided_slice %182 {offsets = [0, 40], sizes = [8, 8], strides = [1, 1]} : vector<8x96xf32> to vector<8x8xf32>
    %194 = vector.extract_strided_slice %182 {offsets = [0, 48], sizes = [8, 8], strides = [1, 1]} : vector<8x96xf32> to vector<8x8xf32>
    %195 = vector.extract_strided_slice %182 {offsets = [0, 56], sizes = [8, 8], strides = [1, 1]} : vector<8x96xf32> to vector<8x8xf32>
    %196 = vector.shape_cast %192 : vector<8x8xf32> to vector<1x8x8xf32>
    %197 = vector.shape_cast %193 : vector<8x8xf32> to vector<1x8x8xf32>
    %198 = vector.shape_cast %194 : vector<8x8xf32> to vector<1x8x8xf32>
    %199 = vector.shape_cast %195 : vector<8x8xf32> to vector<1x8x8xf32>
    %200 = tpu.concatenate %196, %197, %198, %199 in 0 : vector<1x8x8xf32>, vector<1x8x8xf32>, vector<1x8x8xf32>, vector<1x8x8xf32> -> vector<4x8x8xf32>
    %201 = vector.extract_strided_slice %182 {offsets = [0, 64], sizes = [8, 8], strides = [1, 1]} : vector<8x96xf32> to vector<8x8xf32>
    %202 = vector.extract_strided_slice %182 {offsets = [0, 72], sizes = [8, 8], strides = [1, 1]} : vector<8x96xf32> to vector<8x8xf32>
    %203 = vector.extract_strided_slice %182 {offsets = [0, 80], sizes = [8, 8], strides = [1, 1]} : vector<8x96xf32> to vector<8x8xf32>
    %204 = vector.extract_strided_slice %182 {offsets = [0, 88], sizes = [8, 8], strides = [1, 1]} : vector<8x96xf32> to vector<8x8xf32>
    %205 = vector.shape_cast %201 : vector<8x8xf32> to vector<1x8x8xf32>
    %206 = vector.shape_cast %202 : vector<8x8xf32> to vector<1x8x8xf32>
    %207 = vector.shape_cast %203 : vector<8x8xf32> to vector<1x8x8xf32>
    %208 = vector.shape_cast %204 : vector<8x8xf32> to vector<1x8x8xf32>
    %209 = tpu.concatenate %205, %206, %207, %208 in 0 : vector<1x8x8xf32>, vector<1x8x8xf32>, vector<1x8x8xf32>, vector<1x8x8xf32> -> vector<4x8x8xf32>
    "tpu.trace_start"() <{level = 10 : i32, message = "nqd,nkd->nqk"}> : () -> ()
    %cst_66 = arith.constant dense<0.000000e+00> : vector<4x8x8xf32>
    %210 = tpu.matmul %191, %200, %cst_66 {dimension_numbers = #tpu.dot_dimension_numbers<[2], [2], [1], [1], [0, 0, 0, 1, 1, 1], [0], [0]>} : vector<4x8x8xf32>, vector<4x8x8xf32>, vector<4x8x8xf32> -> vector<4x8x8xf32>
    "tpu.trace_stop"() : () -> ()
    %cst_67 = arith.constant 0.353553385 : f32
    %211 = vector.broadcast %cst_67 : f32 to vector<4x8x8xf32>
    %212 = arith.mulf %210, %211 : vector<4x8x8xf32>
    %213 = vector.broadcast %41 : vector<4x1x8xf32> to vector<4x8x8xf32>
    %214 = arith.addf %212, %213 : vector<4x8x8xf32>
    %cst_68 = arith.constant dense<0xFF800000> : vector<4x8xf32>
    %215 = vector.multi_reduction <maximumf>, %214, %cst_68 [2] : vector<4x8x8xf32> to vector<4x8xf32>
    %216 = vector.shape_cast %215 : vector<4x8xf32> to vector<4x8x1xf32>
    %217 = vector.broadcast %216 : vector<4x8x1xf32> to vector<4x8x8xf32>
    %218 = arith.subf %214, %217 : vector<4x8x8xf32>
    %219 = math.exp %218 : vector<4x8x8xf32>
    %cst_69 = arith.constant dense<0.000000e+00> : vector<4x8xf32>
    %220 = vector.multi_reduction <add>, %219, %cst_69 [2] : vector<4x8x8xf32> to vector<4x8xf32>
    %221 = vector.shape_cast %220 : vector<4x8xf32> to vector<4x8x1xf32>
    %222 = tpu.reciprocal %221 {approx = true} : vector<4x8x1xf32> -> vector<4x8x1xf32>
    %223 = vector.broadcast %222 : vector<4x8x1xf32> to vector<4x8x8xf32>
    %224 = arith.mulf %219, %223 : vector<4x8x8xf32>
    "tpu.trace_start"() <{level = 10 : i32, message = "nqk,nkd->nqd"}> : () -> ()
    %cst_70 = arith.constant dense<0.000000e+00> : vector<4x8x8xf32>
    %225 = tpu.matmul %224, %209, %cst_70 {dimension_numbers = #tpu.dot_dimension_numbers<[2], [1], [1], [2], [0, 0, 0, 1, 1, 2], [0], [0]>} : vector<4x8x8xf32>, vector<4x8x8xf32>, vector<4x8x8xf32> -> vector<4x8x8xf32>
    "tpu.trace_stop"() : () -> ()
    %226 = vector.extract_strided_slice %225 {offsets = [0, 0, 0], sizes = [1, 8, 8], strides = [1, 1, 1]} : vector<4x8x8xf32> to vector<1x8x8xf32>
    %227 = vector.shape_cast %226 : vector<1x8x8xf32> to vector<8x8xf32>
    %228 = vector.extract_strided_slice %225 {offsets = [1, 0, 0], sizes = [1, 8, 8], strides = [1, 1, 1]} : vector<4x8x8xf32> to vector<1x8x8xf32>
    %229 = vector.shape_cast %228 : vector<1x8x8xf32> to vector<8x8xf32>
    %230 = vector.extract_strided_slice %225 {offsets = [2, 0, 0], sizes = [1, 8, 8], strides = [1, 1, 1]} : vector<4x8x8xf32> to vector<1x8x8xf32>
    %231 = vector.shape_cast %230 : vector<1x8x8xf32> to vector<8x8xf32>
    %232 = vector.extract_strided_slice %225 {offsets = [3, 0, 0], sizes = [1, 8, 8], strides = [1, 1, 1]} : vector<4x8x8xf32> to vector<1x8x8xf32>
    %233 = vector.shape_cast %232 : vector<1x8x8xf32> to vector<8x8xf32>
    %234 = tpu.concatenate %227, %229, %231, %233 in 1 : vector<8x8xf32>, vector<8x8xf32>, vector<8x8xf32>, vector<8x8xf32> -> vector<8x32xf32>
    %c1_71 = arith.constant 1 : index
    %c0_72 = arith.constant 0 : index
    %c0_73 = arith.constant 0 : index
    %235 = vector.load %arg7[%c1_71, %c0_72, %c0_73] : memref<2x32x32xf32, #tpu.memory_space<vmem>>, vector<1x32x32xf32>
    %236 = vector.shape_cast %235 : vector<1x32x32xf32> to vector<32x32xf32>
    %cst_74 = arith.constant dense<0.000000e+00> : vector<8x32xf32>
    %237 = tpu.matmul %234, %236, %cst_74 {dimension_numbers = #tpu.dot_dimension_numbers<[1], [0], [0], [1], [0, 0, 1, 1], [], []>} : vector<8x32xf32>, vector<32x32xf32>, vector<8x32xf32> -> vector<8x32xf32>
    %c11 = arith.constant 11 : index
    %c0_75 = arith.constant 0 : index
    %238 = vector.load %arg11[%c11, %c0_75] : memref<20x128xf32, #tpu.memory_space<vmem>>, vector<1x32xf32>
    %239 = vector.broadcast %238 : vector<1x32xf32> to vector<8x32xf32>
    %240 = arith.addf %237, %239 : vector<8x32xf32>
    %241 = arith.addf %176, %240 : vector<8x32xf32>
    %c12 = arith.constant 12 : index
    %c0_76 = arith.constant 0 : index
    %242 = vector.load %arg11[%c12, %c0_76] : memref<20x128xf32, #tpu.memory_space<vmem>>, vector<1x32xf32>
    %c13 = arith.constant 13 : index
    %c0_77 = arith.constant 0 : index
    %243 = vector.load %arg11[%c13, %c0_77] : memref<20x128xf32, #tpu.memory_space<vmem>>, vector<1x32xf32>
    %cst_78 = arith.constant dense<0.000000e+00> : vector<8xf32>
    %244 = vector.multi_reduction <add>, %241, %cst_78 [1] : vector<8x32xf32> to vector<8xf32>
    %245 = vector.shape_cast %244 : vector<8xf32> to vector<8x1xf32>
    %cst_79 = arith.constant 3.200000e+01 : f32
    %246 = vector.broadcast %cst_79 : f32 to vector<8x1xf32>
    %247 = arith.divf %245, %246 : vector<8x1xf32>
    %248 = vector.broadcast %247 : vector<8x1xf32> to vector<8x32xf32>
    %249 = arith.subf %241, %248 : vector<8x32xf32>
    %250 = arith.mulf %249, %249 : vector<8x32xf32>
    %cst_80 = arith.constant dense<0.000000e+00> : vector<8xf32>
    %251 = vector.multi_reduction <add>, %250, %cst_80 [1] : vector<8x32xf32> to vector<8xf32>
    %252 = vector.shape_cast %251 : vector<8xf32> to vector<8x1xf32>
    %cst_81 = arith.constant 3.200000e+01 : f32
    %253 = vector.broadcast %cst_81 : f32 to vector<8x1xf32>
    %254 = arith.divf %252, %253 : vector<8x1xf32>
    %cst_82 = arith.constant 9.99999996E-13 : f32
    %255 = vector.broadcast %cst_82 : f32 to vector<8x1xf32>
    %256 = arith.addf %254, %255 : vector<8x1xf32>
    %257 = math.rsqrt %256 : vector<8x1xf32>
    %258 = vector.broadcast %257 : vector<8x1xf32> to vector<8x32xf32>
    %259 = arith.mulf %249, %258 : vector<8x32xf32>
    %260 = vector.broadcast %242 : vector<1x32xf32> to vector<8x32xf32>
    %261 = arith.mulf %259, %260 : vector<8x32xf32>
    %262 = vector.broadcast %243 : vector<1x32xf32> to vector<8x32xf32>
    %263 = arith.addf %261, %262 : vector<8x32xf32>
    %c1_83 = arith.constant 1 : index
    %c0_84 = arith.constant 0 : index
    %c0_85 = arith.constant 0 : index
    %264 = vector.load %arg8[%c1_83, %c0_84, %c0_85] : memref<2x32x64xf32, #tpu.memory_space<vmem>>, vector<1x32x64xf32>
    %265 = vector.shape_cast %264 : vector<1x32x64xf32> to vector<32x64xf32>
    %cst_86 = arith.constant dense<0.000000e+00> : vector<8x64xf32>
    %266 = tpu.matmul %263, %265, %cst_86 {dimension_numbers = #tpu.dot_dimension_numbers<[1], [0], [0], [1], [0, 0, 1, 1], [], []>} : vector<8x32xf32>, vector<32x64xf32>, vector<8x64xf32> -> vector<8x64xf32>
    %c14 = arith.constant 14 : index
    %c0_87 = arith.constant 0 : index
    %267 = vector.load %arg11[%c14, %c0_87] : memref<20x128xf32, #tpu.memory_space<vmem>>, vector<1x64xf32>
    %268 = vector.broadcast %267 : vector<1x64xf32> to vector<8x64xf32>
    %269 = arith.addf %266, %268 : vector<8x64xf32>
    %270 = arith.mulf %269, %269 : vector<8x64xf32>
    %271 = arith.mulf %269, %270 : vector<8x64xf32>
    %cst_88 = arith.constant 4.471500e-02 : f32
    %272 = vector.broadcast %cst_88 : f32 to vector<8x64xf32>
    %273 = arith.mulf %272, %271 : vector<8x64xf32>
    %274 = arith.addf %269, %273 : vector<8x64xf32>
    %cst_89 = arith.constant 0.797884583 : f32
    %275 = vector.broadcast %cst_89 : f32 to vector<8x64xf32>
    %276 = arith.mulf %275, %274 : vector<8x64xf32>
    %277 = math.tanh %276 : vector<8x64xf32>
    %cst_90 = arith.constant 1.000000e+00 : f32
    %278 = vector.broadcast %cst_90 : f32 to vector<8x64xf32>
    %279 = arith.addf %278, %277 : vector<8x64xf32>
    %cst_91 = arith.constant 5.000000e-01 : f32
    %280 = vector.broadcast %cst_91 : f32 to vector<8x64xf32>
    %281 = arith.mulf %280, %279 : vector<8x64xf32>
    %282 = arith.mulf %269, %281 : vector<8x64xf32>
    %c1_92 = arith.constant 1 : index
    %c0_93 = arith.constant 0 : index
    %c0_94 = arith.constant 0 : index
    %283 = vector.load %arg9[%c1_92, %c0_93, %c0_94] : memref<2x64x32xf32, #tpu.memory_space<vmem>>, vector<1x64x32xf32>
    %284 = vector.shape_cast %283 : vector<1x64x32xf32> to vector<64x32xf32>
    %cst_95 = arith.constant dense<0.000000e+00> : vector<8x32xf32>
    %285 = tpu.matmul %282, %284, %cst_95 {dimension_numbers = #tpu.dot_dimension_numbers<[1], [0], [0], [1], [0, 0, 1, 1], [], []>} : vector<8x64xf32>, vector<64x32xf32>, vector<8x32xf32> -> vector<8x32xf32>
    %c15 = arith.constant 15 : index
    %c0_96 = arith.constant 0 : index
    %286 = vector.load %arg11[%c15, %c0_96] : memref<20x128xf32, #tpu.memory_space<vmem>>, vector<1x32xf32>
    %287 = vector.broadcast %286 : vector<1x32xf32> to vector<8x32xf32>
    %288 = arith.addf %285, %287 : vector<8x32xf32>
    %289 = arith.addf %263, %288 : vector<8x32xf32>
    %c16 = arith.constant 16 : index
    %c0_97 = arith.constant 0 : index
    %290 = vector.load %arg11[%c16, %c0_97] : memref<20x128xf32, #tpu.memory_space<vmem>>, vector<1x32xf32>
    %c17 = arith.constant 17 : index
    %c0_98 = arith.constant 0 : index
    %291 = vector.load %arg11[%c17, %c0_98] : memref<20x128xf32, #tpu.memory_space<vmem>>, vector<1x32xf32>
    %cst_99 = arith.constant dense<0.000000e+00> : vector<8xf32>
    %292 = vector.multi_reduction <add>, %289, %cst_99 [1] : vector<8x32xf32> to vector<8xf32>
    %293 = vector.shape_cast %292 : vector<8xf32> to vector<8x1xf32>
    %cst_100 = arith.constant 3.200000e+01 : f32
    %294 = vector.broadcast %cst_100 : f32 to vector<8x1xf32>
    %295 = arith.divf %293, %294 : vector<8x1xf32>
    %296 = vector.broadcast %295 : vector<8x1xf32> to vector<8x32xf32>
    %297 = arith.subf %289, %296 : vector<8x32xf32>
    %298 = arith.mulf %297, %297 : vector<8x32xf32>
    %cst_101 = arith.constant dense<0.000000e+00> : vector<8xf32>
    %299 = vector.multi_reduction <add>, %298, %cst_101 [1] : vector<8x32xf32> to vector<8xf32>
    %300 = vector.shape_cast %299 : vector<8xf32> to vector<8x1xf32>
    %cst_102 = arith.constant 3.200000e+01 : f32
    %301 = vector.broadcast %cst_102 : f32 to vector<8x1xf32>
    %302 = arith.divf %300, %301 : vector<8x1xf32>
    %cst_103 = arith.constant 9.99999996E-13 : f32
    %303 = vector.broadcast %cst_103 : f32 to vector<8x1xf32>
    %304 = arith.addf %302, %303 : vector<8x1xf32>
    %305 = math.rsqrt %304 : vector<8x1xf32>
    %306 = vector.broadcast %305 : vector<8x1xf32> to vector<8x32xf32>
    %307 = arith.mulf %297, %306 : vector<8x32xf32>
    %308 = vector.broadcast %290 : vector<1x32xf32> to vector<8x32xf32>
    %309 = arith.mulf %307, %308 : vector<8x32xf32>
    %310 = vector.broadcast %291 : vector<1x32xf32> to vector<8x32xf32>
    %311 = arith.addf %309, %310 : vector<8x32xf32>
    %312 = vector.extract_strided_slice %311 {offsets = [0, 0], sizes = [1, 32], strides = [1, 1]} : vector<8x32xf32> to vector<1x32xf32>
    %c0_104 = arith.constant 0 : index
    %c0_105 = arith.constant 0 : index
    %c0_106 = arith.constant 0 : index
    %313 = vector.load %arg3[%c0_104, %c0_105, %c0_106] : memref<1x1x1xf32, #tpu.memory_space<vmem>>, vector<1x1x1xf32>
    %314 = vector.shape_cast %313 : vector<1x1x1xf32> to vector<1x1xf32>
    %c0_107 = arith.constant 0 : index
    %c0_108 = arith.constant 0 : index
    %315 = vector.load %arg10[%c0_107, %c0_108] : memref<32x2xf32, #tpu.memory_space<vmem>>, vector<32x2xf32>
    %cst_109 = arith.constant dense<0.000000e+00> : vector<1x2xf32>
    %316 = tpu.matmul %312, %315, %cst_109 {dimension_numbers = #tpu.dot_dimension_numbers<[1], [0], [0], [1], [0, 0, 1, 1], [], []>} : vector<1x32xf32>, vector<32x2xf32>, vector<1x2xf32> -> vector<1x2xf32>
    %c18 = arith.constant 18 : index
    %c0_110 = arith.constant 0 : index
    %317 = vector.load %arg11[%c18, %c0_110] : memref<20x128xf32, #tpu.memory_space<vmem>>, vector<1x2xf32>
    %318 = vector.broadcast %314 : vector<1x1xf32> to vector<1x2xf32>
    %319 = arith.mulf %318, %317 : vector<1x2xf32>
    %320 = arith.addf %316, %319 : vector<1x2xf32>
    %c19 = arith.constant 19 : index
    %c0_111 = arith.constant 0 : index
    %321 = vector.load %arg11[%c19, %c0_111] : memref<20x128xf32, #tpu.memory_space<vmem>>, vector<1x2xf32>
    %322 = arith.addf %320, %321 : vector<1x2xf32>
    %323 = vector.shape_cast %322 : vector<1x2xf32> to vector<1x1x2xf32>
    %c0_112 = arith.constant 0 : index
    %c0_113 = arith.constant 0 : index
    %c0_114 = arith.constant 0 : index
    %324 = vector.load %arg12[%c0_112, %c0_113, %c0_114] : memref<1x1x2xf32, #tpu.memory_space<vmem>>, vector<1x1x2xf32>
    tpu.vector_store %arg12[%c0_112, %c0_113, %c0_114], %323 {strides = array<i32>} : memref<1x1x2xf32, #tpu.memory_space<vmem>>, vector<1x1x2xf32>,
    return
  }
  func.func @transform_0(%arg0: i32) -> (i32, i32) {
    %c0_i32 = arith.constant 0 : i32
    %c0_i32_0 = arith.constant 0 : i32
    return %arg0, %c0_i32 : i32, i32
  }
  func.func @transform_1(%arg0: i32) -> (i32, i32, i32) {
    %c0_i32 = arith.constant 0 : i32
    %c0_i32_0 = arith.constant 0 : i32
    %c0_i32_1 = arith.constant 0 : i32
    return %arg0, %c0_i32, %c0_i32_0 : i32, i32, i32
  }
  func.func @transform_2(%arg0: i32) -> (i32, i32, i32) {
    %c0_i32 = arith.constant 0 : i32
    %c0_i32_0 = arith.constant 0 : i32
    %c0_i32_1 = arith.constant 0 : i32
    return %arg0, %c0_i32, %c0_i32_0 : i32, i32, i32
  }
  func.func @transform_3(%arg0: i32) -> (i32, i32) {
    %c0_i32 = arith.constant 0 : i32
    %c0_i32_0 = arith.constant 0 : i32
    %c0_i32_1 = arith.constant 0 : i32
    return %c0_i32, %c0_i32_0 : i32, i32
  }
  func.func @transform_4(%arg0: i32) -> (i32, i32) {
    %c0_i32 = arith.constant 0 : i32
    %c0_i32_0 = arith.constant 0 : i32
    %c0_i32_1 = arith.constant 0 : i32
    return %c0_i32, %c0_i32_0 : i32, i32
  }
  func.func @transform_5(%arg0: i32) -> (i32, i32, i32) {
    %c0_i32 = arith.constant 0 : i32
    %c0_i32_0 = arith.constant 0 : i32
    %c0_i32_1 = arith.constant 0 : i32
    %c0_i32_2 = arith.constant 0 : i32
    return %c0_i32, %c0_i32_0, %c0_i32_1 : i32, i32, i32
  }
  func.func @transform_6(%arg0: i32) -> (i32, i32, i32) {
    %c0_i32 = arith.constant 0 : i32
    %c0_i32_0 = arith.constant 0 : i32
    %c0_i32_1 = arith.constant 0 : i32
    %c0_i32_2 = arith.constant 0 : i32
    return %c0_i32, %c0_i32_0, %c0_i32_1 : i32, i32, i32
  }
  func.func @transform_7(%arg0: i32) -> (i32, i32, i32) {
    %c0_i32 = arith.constant 0 : i32
    %c0_i32_0 = arith.constant 0 : i32
    %c0_i32_1 = arith.constant 0 : i32
    %c0_i32_2 = arith.constant 0 : i32
    return %c0_i32, %c0_i32_0, %c0_i32_1 : i32, i32, i32
  }
  func.func @transform_8(%arg0: i32) -> (i32, i32, i32) {
    %c0_i32 = arith.constant 0 : i32
    %c0_i32_0 = arith.constant 0 : i32
    %c0_i32_1 = arith.constant 0 : i32
    %c0_i32_2 = arith.constant 0 : i32
    return %c0_i32, %c0_i32_0, %c0_i32_1 : i32, i32, i32
  }
  func.func @transform_9(%arg0: i32) -> (i32, i32) {
    %c0_i32 = arith.constant 0 : i32
    %c0_i32_0 = arith.constant 0 : i32
    %c0_i32_1 = arith.constant 0 : i32
    return %c0_i32, %c0_i32_0 : i32, i32
  }
  func.func @transform_10(%arg0: i32) -> (i32, i32) {
    %c0_i32 = arith.constant 0 : i32
    %c0_i32_0 = arith.constant 0 : i32
    %c0_i32_1 = arith.constant 0 : i32
    return %c0_i32, %c0_i32_0 : i32, i32
  }
  func.func @transform_11(%arg0: i32) -> (i32, i32, i32) {
    %c0_i32 = arith.constant 0 : i32
    %c0_i32_0 = arith.constant 0 : i32
    %c0_i32_1 = arith.constant 0 : i32
    return %arg0, %c0_i32, %c0_i32_0 : i32, i32, i32
  }
}

</mosaic_0001>

<bundles_post_ra>
// kernel: tpu_custom_call.1
= control target key start
LH: loop header
LB: loop body
LE: loop exit
PB: predicated region body
PF: predicated region fallthrough
CT: control target
= control target key end

     0   :  { %16 = vsyncpa [#allocation3], 0  ;;  %s2359_s0 = inlined_call_operand.vmem [shape: s32[16,1], index: 0, kind: input, shape index: {}]   ;;  %s2360_s1 = inlined_call_operand.vmem [shape: s32[2,1,8], index: 1, kind: input, shape index: {}]   ;;  %s2361_s2 = inlined_call_operand.vmem [shape: f32[2,1,1], index: 2, kind: input, shape index: {}]   ;;  %s2362_s3 = inlined_call_operand.vmem [shape: f32[50,32], index: 3, kind: input, shape index: {}]   ;;  %s2363_s4 = inlined_call_operand.vmem [shape: f32[16,32], index: 4, kind: input, shape index: {}]   ;;  %s2364_s5 = inlined_call_operand.vmem [shape: f32[2,32,96], index: 5, kind: input, shape index: {}]   ;;  %s2365_s6 = inlined_call_operand.vmem [shape: f32[2,32,32], index: 6, kind: input, shape index: {}]   ;;  %s2366_s7 = inlined_call_operand.vmem [shape: f32[2,32,64], index: 7, kind: input, shape index: {}]   ;;  %s2367_s8 = inlined_call_operand.vmem [shape: f32[2,64,32], index: 8, kind: input, shape index: {}]   ;;  %s2368_s9 = inlined_call_operand.vmem [shape: f32[32,2], index: 9, kind: input, shape index: {}]   ;;  %s2369_s10 = inlined_call_operand.vmem [shape: f32[20,128], index: 10, kind: input, shape index: {}]   ;;  %s2370_s11 = inlined_call_operand.hbm [shape: f32[2,1,2], index: 11, kind: output, shape index: {}]  }
   0x1   :  { %18 = vsyncpa [#allocation3 + $0x1], 0  ;;  %s1895_s17 = smov 0   ;;  %s1897_s18 = smov 0  }
   0x2   :  { %s1899_s19 = smov 0   ;;  %s1901_s20 = smov 0  }
   0x3 LB: > { %s1916_s21 = sadd.s32 4294967295, %s1822_s20   ;;  %s1569_s22 = sadd.s32 4294967294, %s1822_s20   ;;  %s1822_s20 = sphi %s1901_s20, %s2396_s20   ;;  %s1818_s19 = sphi %s1899_s19, %s2395_s19   ;;  %s1814_s18 = sphi %s1897_s18, %s2394_s18   ;;  %s1810_s17 = sphi %s1895_s17, %s2393_s17  }
   0x4   : > { %s1920_s23 = sadd.s32 1, %s1822_s20   ;;  %s277_s24 = sadd.s32 1, %s1818_s19 }
   0x5   : > { %s274_s25 = ssub.s32 %s1822_s20, %s1920_s23  ;;  %p287_p0 = scmp.ne.s32.totalorder %s1818_s19, %s1814_s18 }
   0x6   : > { %p275_p1 = scmp.eq.s32.totalorder %s274_s25, 0  ;;  %p288_p2 = scmp.eq.s32.totalorder %s1916_s21, 1 }
   0x7   : > { %p293_p3 = scmp.ne.s32.totalorder %s1814_s18, %s1810_s17  ;;  %p294_p4 = scmp.eq.s32.totalorder %s1569_s22, 1 }
   0x8   : > { %s1931_s26 = scalar_select %p275_p1, %s1818_s19, %s277_s24  }
   0x9   : > { %p1933_p5 = por %p288_p2, %p287_p0  ;;  %p1937_p6 = por %p294_p4, %p293_p3 }
   0xa   : > { %2381 = sst [smem:[#allocation5_spill]] %s1931_s26  ;;  %p1572_p7 = scmp.ge.s32.totalorder %s1822_s20, 1 }
   0xb   : > { %p355_p8 = scmp.lt.s32.totalorder %s1822_s20, 3 }
   0xd   : > { %p356_p9 = pnand %p1572_p7, %p355_p8 }
   0xe   : > { %p399_p10 = scmp.lt.s32.totalorder (!%p356_p9), %s1916_s21, 1  ;;  %s2376_s15 = smov (!%p356_p9), 112  }
   0xf   : > { %359 = sbr.rel (%p356_p9) target bundleno = 4612 (0x1204), region = 64  ;;  %s2375_s16 = smov (!%p356_p9), 120  }
  0x10   : > { %s2380_s24 = smov (!%p356_p9), 104   ;;  %s2373_s25 = smov (!%p356_p9), 96  }
  0x11   : > { %s2371_s30 = smov (!%p356_p9), 64   ;;  %s2378_s13 = smov (!%p356_p9), 8  }
  0x12   : > { %s2379_s26 = smov (!%p356_p9), 24  }
  0x14   : > { %v424_v0 = vld [vmem:[%s2362_s3 + $0x30] sm:$0x3]  ;;  %vm430_vm0 = vcmask 1041408   ;;  %v423_v1 = vld [vmem:[%s2362_s3 + $0x28] sm:$0xff]  ;;  %v1824_v2 = vmov 0   ;;  %s1951_s14 = scalar_select %p399_p10, %s1916_s21, 1  ;;  %v410_v9 = vlaneseq }
  0x15   : > { %1682 = vset.pattern.permute.xlu0 %v1824_v2  ;;  %1575 = vmatpush.msk.msra.mxu0 %vm430_vm0, %v424_v0  ;;  %v422_v3 = vld [vmem:[%s2362_s3 + $0x20] sm:$0xff]  ;;  %v421_v4 = vld [vmem:[%s2362_s3 + $0x18] sm:$0xff]  ;;  %v420_v5 = vld [vmem:[%s2362_s3 + $0x10] sm:$0xff]  ;;  %vm426_vm1 = vcmask 408576   ;;  %v1825_v12 = vmov 0.0   ;;  %vm456_vm3 = vcmask 261120  }
  0x16   : > { %1693 = vset.pattern.permute.xlu1 %v1824_v2  ;;  %s1573_s22 = sshll.u32 %s1951_s14, 3  ;;  %v419_v7 = vld [vmem:[%s2362_s3 + $0x8] sm:$0xff]  ;;  %v418_v8 = vld [vmem:[%s2362_s3] sm:$0xff]  ;;  %v411_v10 = vand.u32 127, %v410_v9  ;;  %v1826_v18 = vmov 32.0   ;;  %v497_v30 = vld [vmem:[%s2364_s5 + $0x18] sm:$0xff]  ;;  %s405_s29 = scalar_lea.vmem %s2360_s1, %s1951_s14 }
  0x17   : > { %444 = vmatpush.msra.mxu0 %v423_v1  ;;  %s402_s12 = scalar_lea.vmem %s2359_s0, %s1573_s22  ;;  %v425_v14 = vld [vmem:[%s2363_s4] sm:$0xff]  ;;  %1712 = vrcp.f32 %v1826_v18  ;;  %515 = vmatpush.msra.mxu1 %v497_v30  ;;  %v496_v31 = vld [vmem:[%s2364_s5 + $0x10] sm:$0xff]  ;;  %v495_v32 = vld [vmem:[%s2364_s5 + $0x8] sm:$0xff]  ;;  %vm532_vm8 = vcmask 64512   ;;  %vm807_vm9 = vcmask 130048   ;;  %vm809_vm10 = vcmask 195584  }
  0x18   : > { %v409_v6 = vld [vmem:[%s402_s12] sm:$0xff]  ;;  %s2377_s12 = smov 16   ;;  %vm917_vm14 = vcmask 523264   ;;  %s2390_s22 = smov 24  }
  0x19   : > { %445 = vmatpush.msra.mxu0 %v422_v3  ;;  %413 = vperm.xlu0 %1682, %v409_v6   ;;  %v494_v33 = vld [vmem:[%s2364_s5] sm:$0xff] }
  0x1a   : > { %516 = vmatpush.msra.mxu1 %v496_v31  ;;  %v1694_v43 = vld [vmem:[%s2369_s10] ss:$0 sm:$0xff]  ;;  %v1695_v46 = vld [vmem:[%s2369_s10 + $0x1] ss:$0 sm:$0xff]  ;;  %v1696_v49 = vld [vmem:[%s2369_s10 + $0x2] ss:$0 sm:$0xff] }
  0x1b   : > { %446 = vmatpush.msra.mxu0 %v421_v4  ;;  %v490_v59 = vld [vmem:[%s405_s29] sm:$0x1]  ;;  %s2391_s29 = smov 16  }
  0x1c   : > { %517 = vmatpush.msra.mxu1 %v495_v32  ;;  %v491_v60 = vcvt.s32.f32 %v490_v59  ;;  %v814_v59 = vld [vmem:[%s2365_s6 + $0x18] sm:$0xff] }
  0x1d   : > { %447 = vmatpush.msra.mxu0 %v420_v5  ;;  %v1713_v19 = vpop.eup %1712 }
  0x1e   : > { %v461_v20 = vmul.f32 32.0, %v1713_v19  ;;  %vm465_vm4 = vweird.f32 %v1713_v19  ;;  %518 = vmatpush.msra.mxu1 %v494_v33  ;;  %v492_v61 = vsub.f32 1.0, %v491_v60  ;;  %v813_v60 = vld [vmem:[%s2365_s6 + $0x10] sm:$0xff] }
  0x1f   : > { %448 = vmatpush.msra.mxu0 %v419_v7 }
  0x20   : > { %v462_v21 = vsub.f32 1.0, %v461_v20  ;;  %v493_v62 = vmul.f32 -1e+09, %v492_v61  ;;  %v812_v61 = vld [vmem:[%s2365_s6 + $0x8] sm:$0xff] }
  0x21   : > { %449 = vmatpush.msra.mxu0 %v418_v8 }
  0x22   : > { %v463_v22 = vmul.f32 %v1713_v19, %v462_v21  ;;  %v2036_v63 = vperm.slane %v493_v62, 0  ;;  %v811_v62 = vld [vmem:[%s2365_s6] sm:$0xff] }
  0x24   : > { %v464_v23 = vadd.f32 %v1713_v19, %v463_v22 }
  0x26   : > { %v1976_v24 = vsel %vm465_vm4, %v1713_v19, %v464_v23 }
  0x8b   : > { %v414_v11 = vpop.permute.xlu0 %413 }
  0x8c   : > { %vm415_vm2 = vcmp.eq.s32.totalorder %v414_v11, %v411_v10 }
  0x8d   : > { %v1574_v13 = vsel %vm415_vm2, 1.0, %v1825_v12 }
  0x8e   : > { %1576 = vmatmul.msk.f32.vlgmr.msra.gmra.mxu0 %vm426_vm1, %v1574_v13 }
 0x10b   : > { %v451_v15 = vpop.f32.mrf.mxu0 }
 0x10c   : > { %v452_v16 = vadd.f32 %v451_v15, %v425_v14 }
 0x10e   : > { %v457_v17 = vsel %vm456_vm3, %v452_v16, 0.0 }
 0x10f   : > { %458 = vadd.xlane.f32.xlu0 %v457_v17 }
 0x182   : > { %v459_v25 = vpop.xlane.xlu0 %458 }
 0x183   : > { %v467_v26 = vmul.f32 %v1976_v24, %v459_v25 }
 0x185   : > { %v468_v27 = vsub.f32 %v452_v16, %v467_v26 }
 0x187   : > { %v469_v28 = vmul.f32 %v468_v27, %v468_v27 }
 0x189   : > { %v470_v29 = vsel %vm456_vm3, %v469_v28, 0.0 }
 0x18a   : > { %471 = vadd.xlane.f32.xlu1 %v470_v29 }
 0x1fd   : > { %v472_v34 = vpop.xlane.xlu1 %471 }
 0x1fe   : > { %v473_v35 = vmul.f32 %v472_v34, %v1976_v24 }
 0x200   : > { %v474_v36 = vadd.f32 1e-12, %v473_v35 }
 0x202   : > { %1714 = vrsqrt.f32 %v474_v36  ;;  %vm481_vm6 = vweird.f32 %v474_v36 }
 0x208   : > { %v1715_v37 = vpop.eup %1714 }
 0x209   : > { %v476_v38 = vmul.f32 %v1715_v37, %v474_v36  ;;  %vm482_vm5 = vweird.f32 %v1715_v37 }
 0x20a   : > { %vm483_vm7 = vmor %vm481_vm6, %vm482_vm5 }
 0x20b   : > { %v477_v39 = vmul.f32 %v1715_v37, %v476_v38 }
 0x20d   : > { %v478_v40 = vmul.f32 0.5, %v477_v39 }
 0x20f   : > { %v479_v41 = vsub.f32 1.5, %v478_v40 }
 0x211   : > { %v480_v42 = vmul.f32 %v1715_v37, %v479_v41 }
 0x213   : > { %v484_v44 = vsel %vm483_vm7, %v1715_v37, %v480_v42 }
 0x214   : > { %v485_v45 = vmul.f32 %v484_v44, %v468_v27 }
 0x216   : > { %v487_v47 = vmul.f32 %v1694_v43, %v485_v45 }
 0x218   : > { %v1999_v48 = vadd.f32 %v1695_v46, %v487_v47 }
 0x21a   : > { %1577 = vmatmul.msk.f32.vlgmr.msra.gmra.mxu1 %vm456_vm3, %v1999_v48 }
 0x297   : > { %v520_v50 = vpop.f32.mrf.mxu1 }
 0x298   : > { %v2006_v51 = vadd.f32 %v1696_v49, %v520_v50 }
 0x29a   : > { %526 = vrot.lane.b32.xlu2 %v2006_v51, %s2376_s15  ;;  %524 = vrot.lane.b32.xlu1 %v2006_v51, %s2375_s16  ;;  %s1492_s16 = scalar_lea.hbm %s2370_s11, %s1916_s21 }
 0x2a2   : > { %528 = vrot.lane.b32.xlu2 %v2006_v51, %s2380_s24  ;;  %s2388_s24 = smov 64  }
 0x2aa   : > { %530 = vrot.lane.b32.xlu2 %v2006_v51, %s2373_s25 }
 0x2f4   : > { %v527_v52 = vpop.permute.xlu2 %526 }
 0x2fc   : > { %v529_v53 = vpop.permute.xlu2 %528 }
 0x2fd   : > { %609 = vrot.lane.b32.xlu1 %v529_v53, %s2373_s25  ;;  %v1683_v16 = vpack.i.bf16 %v529_v53, %v527_v52 }
 0x304   : > { %v531_v54 = vpop.permute.xlu2 %530 }
 0x305   : > { %1578 = vmatpush.xpose.msk.msra.mxu2 %vm532_vm8, %v531_v54 }
 0x308   : > { %1579 = vmatmul.msk.f32.vlgmr.msra.gmra.mxu2 %vm532_vm8, %v2006_v51 }
 0x30c   : > { %v2020_v55 = vpop.permute.xlu1 %524 }
 0x30d   : > { %557 = vrot.lane.b32.xlu2 %v2020_v55, %s2373_s25 }
 0x315   : > { %583 = vrot.lane.b32.xlu2 %v527_v52, %s2373_s25  ;;  %s2384_s25 = smov 104  }
 0x367   : > { %v558_v56 = vpop.permute.xlu2 %557 }
 0x368   : > { %1580 = vmatpush.xpose.msk.msra.mxu3 %vm532_vm8, %v558_v56 }
 0x36b   : > { %1581 = vmatmul.msk.f32.vlgmr.msra.gmra.mxu3 %vm532_vm8, %v2020_v55 }
 0x36f   : > { %v610_v57 = vpop.permute.xlu1 %609  ;;  %v584_v58 = vpop.permute.xlu2 %583 }
 0x370   : > { %1582 = vmatpush.xpose.msk.msrb.mxu2 %vm532_vm8, %v584_v58  ;;  %1584 = vmatpush.xpose.msk.msrb.mxu3 %vm532_vm8, %v610_v57 }
 0x373   : > { %1583 = vmatmul.msk.f32.vlgmr.msrb.gmra.mxu2 %vm532_vm8, %v527_v52  ;;  %1585 = vmatmul.msk.f32.vlgmr.msrb.gmra.mxu3 %vm532_vm8, %v529_v53 }
 0x38b   : > { %v554_v0 = vpop.f32.mrf.mxu2 }
 0x38c   : > { %v635_v1 = vmul.f32 0.35355338, %v554_v0 }
 0x38e   : > { %v642_v2 = vadd.f32 %v2036_v63, %v635_v1 }
 0x390   : > { %v646_v3 = vsel %vm532_vm8, %v642_v2, -inf }
 0x391   : > { %647 = vmax.xlane.f32.xlu0 %v646_v3 }
 0x3ee   : > { %v580_v4 = vpop.f32.mrf.mxu3 }
 0x3ef   : > { %v636_v5 = vmul.f32 0.35355338, %v580_v4 }
 0x3f1   : > { %v643_v6 = vadd.f32 %v2036_v63, %v636_v5 }
 0x3f3   : > { %v649_v7 = vsel %vm532_vm8, %v643_v6, -inf }
 0x3f4   : > { %650 = vmax.xlane.f32.xlu2 %v649_v7  ;;  %v1697_v7 = vld [vmem:[%s2369_s10 + $0x3] ss:$0 sm:$0xff] }
 0x3f6   : > { %v606_v8 = vpop.f32.mrf.mxu2  ;;  %v632_v9 = vpop.f32.mrf.mxu3 }
 0x3f7   : > { %v637_v10 = vmul.f32 0.35355338, %v606_v8  ;;  %v638_v11 = vmul.f32 0.35355338, %v632_v9 }
 0x3f9   : > { %v645_v12 = vadd.f32 %v2036_v63, %v638_v11  ;;  %v644_v13 = vadd.f32 %v2036_v63, %v637_v10 }
 0x3fb   : > { %v655_v14 = vsel %vm532_vm8, %v645_v12, -inf  ;;  %v652_v15 = vsel %vm532_vm8, %v644_v13, -inf }
 0x3fc   : > { %656 = vmax.xlane.f32.xlu0 %v655_v14  ;;  %653 = vmax.xlane.f32.xlu1 %v652_v15 }
 0x404   : > { %v648_v17 = vpop.xlane.xlu0 %647 }
 0x405   : > { %v658_v27 = vsub.f32 %v642_v2, %v648_v17  ;;  %v872_v17 = vld [vmem:[%s2366_s7 + $0x18] sm:$0xff] }
 0x407   : > { %v662_v31 = vmul.f32 1.442695, %v658_v27 }
 0x415   : > { %1684 = vrot.lane.b32.xlu1 %v1683_v16, %s2371_s30 }
 0x467   : > { %v651_v18 = vpop.xlane.xlu2 %650 }
 0x468   : > { %v659_v19 = vsub.f32 %v643_v6, %v651_v18  ;;  %v870_v18 = vld [vmem:[%s2366_s7 + $0x8] sm:$0xff] }
 0x46a   : > { %v664_v20 = vmul.f32 1.442695, %v659_v19  ;;  %v869_v19 = vld [vmem:[%s2366_s7] sm:$0xff] }
 0x46c   : > { %1716 = vpow2.f32 %v664_v20 }
 0x46f   : > { %v657_v21 = vpop.xlane.xlu0 %656  ;;  %v654_v22 = vpop.xlane.xlu1 %653 }
 0x470   : > { %v661_v23 = vsub.f32 %v645_v12, %v657_v21  ;;  %v660_v25 = vsub.f32 %v644_v13, %v654_v22 }
 0x472   : > { %v1717_v26 = vpop.eup %1716  ;;  %v668_v28 = vmul.f32 1.442695, %v661_v23  ;;  %v666_v29 = vmul.f32 1.442695, %v660_v25 }
 0x473   : > { %v673_v30 = vsel %vm532_vm8, %v1717_v26, 0.0 }
 0x474   : > { %1718 = vpow2.f32 %v668_v28  ;;  %674 = vadd.xlane.f32.xlu0 %v673_v30  ;;  %v1698_v30 = vld [vmem:[%s2369_s10 + $0x4] ss:$0 sm:$0xff] }
 0x475   : > { %1720 = vpow2.f32 %v666_v29 }
 0x476   : > { %1722 = vpow2.f32 %v662_v31 }
 0x47a   : > { %v1719_v32 = vpop.eup %1718 }
 0x47b   : > { %v1721_v33 = vpop.eup %1720  ;;  %v679_v34 = vsel %vm532_vm8, %v1719_v32, 0.0 }
 0x47c   : > { %680 = vadd.xlane.f32.xlu2 %v679_v34  ;;  %v676_v35 = vsel %vm532_vm8, %v1721_v33, 0.0  ;;  %v1723_v36 = vpop.eup %1722 }
 0x47d   : > { %677 = vadd.xlane.f32.xlu0 %v676_v35  ;;  %v670_v37 = vsel %vm532_vm8, %v1723_v36, 0.0 }
 0x484   : > { %671 = vadd.xlane.f32.xlu2 %v670_v37  ;;  %v913_v37 = vld [vmem:[%s2367_s8 + $0x30] sm:$0xff] }
 0x487   : > { %v1685_v38 = vpop.permute.xlu1 %1684 }
 0x488   : > { %v1686_v39 = vunpack.i.l.bf16 %v1685_v38  ;;  %v1687_v53 = vunpack.i.h.bf16 %v1685_v38  ;;  %v912_v38 = vld [vmem:[%s2367_s8 + $0x28] sm:$0xff] }
 0x48a   : > { %763 = vmatpush.msra.mxu3 %v1686_v39  ;;  %v911_v39 = vld [vmem:[%s2367_s8 + $0x20] sm:$0xff] }
 0x491   : > { %716 = vrot.lane.b32.xlu0 %v2020_v55, %s2371_s30 }
 0x49c   : > { %690 = vrot.lane.b32.xlu2 %v2006_v51, %s2371_s30  ;;  %s2385_s30 = smov 112  }
 0x4e7   : > { %v675_v40 = vpop.xlane.xlu0 %674 }
 0x4ef   : > { %v681_v41 = vpop.xlane.xlu2 %680 }
 0x4f0   : > { %v678_v42 = vpop.xlane.xlu0 %677 }
 0x4f1   : > { %1724 = vrcp.f32 %v678_v42  ;;  %v908_v42 = vld [vmem:[%s2367_s8 + $0x8] sm:$0xff] }
 0x4f7   : > { %v1725_v43 = vpop.eup %1724  ;;  %v672_v44 = vpop.xlane.xlu2 %671 }
 0x4f8   : > { %v688_v45 = vmul.f32 %v1725_v43, %v1721_v33  ;;  %1726 = vrcp.f32 %v672_v44  ;;  %v1699_v33 = vld [vmem:[%s2369_s10 + $0x5] ss:$0 sm:$0xff]  ;;  %v1700_v44 = vld [vmem:[%s2369_s10 + $0x6] ss:$0 sm:$0xff] }
 0x4f9   : > { %1728 = vrcp.f32 %v675_v40  ;;  %v910_v40 = vld [vmem:[%s2367_s8 + $0x18] sm:$0xff]  ;;  %v907_v43 = vld [vmem:[%s2367_s8] sm:$0xff] }
 0x4fa   : > { %1588 = vmatmul.msk.f32.vlgmr.msra.gmra.mxu3 %vm532_vm8, %v688_v45  ;;  %1730 = vrcp.f32 %v681_v41  ;;  %v909_v41 = vld [vmem:[%s2367_s8 + $0x10] sm:$0xff] }
 0x4fe   : > { %v1727_v46 = vpop.eup %1726 }
 0x4ff   : > { %v691_v47 = vpop.permute.xlu2 %690  ;;  %v686_v49 = vmul.f32 %v1727_v46, %v1723_v36  ;;  %v1729_v50 = vpop.eup %1728  ;;  %v914_v36 = vld [vmem:[%s2367_s8 + $0x38] sm:$0xff] }
 0x500   : > { %711 = vmatpush.msrb.mxu1 %v691_v47  ;;  %v687_v51 = vmul.f32 %v1729_v50, %v1717_v26  ;;  %v1731_v54 = vpop.eup %1730  ;;  %929 = vmatpush.msrb.mxu3 %v914_v36 }
 0x501   : > { %1586 = vmatmul.msk.f32.vlgmr.msrb.gmra.mxu1 %vm532_vm8, %v686_v49  ;;  %v689_v55 = vmul.f32 %v1731_v54, %v1719_v32 }
 0x502   : > { %832 = vmatpush.msra.mxu1 %v814_v59  ;;  %930 = vmatpush.msrb.mxu3 %v913_v37 }
 0x503   : > { %v717_v52 = vpop.permute.xlu0 %716 }
 0x504   : > { %737 = vmatpush.msra.mxu2 %v717_v52  ;;  %833 = vmatpush.msra.mxu1 %v813_v60 }
 0x505   : > { %1587 = vmatmul.msk.f32.vlgmr.msra.gmra.mxu2 %vm532_vm8, %v687_v51  ;;  %931 = vmatpush.msrb.mxu3 %v912_v38 }
 0x506   : > { %789 = vmatpush.msrb.mxu2 %v1687_v53  ;;  %834 = vmatpush.msra.mxu1 %v812_v61 }
 0x507   : > { %932 = vmatpush.msrb.mxu3 %v911_v39 }
 0x508   : > { %835 = vmatpush.msra.mxu1 %v811_v62  ;;  %890 = vmatpush.msra.mxu2 %v872_v17  ;;  %v1702_v17 = vld [vmem:[%s2369_s10 + $0x8] ss:$0 sm:$0xff] }
 0x509   : > { %933 = vmatpush.msrb.mxu3 %v910_v40 }
 0x50b   : > { %934 = vmatpush.msrb.mxu3 %v909_v41 }
 0x50d   : > { %1589 = vmatmul.msk.f32.vlgmr.msrb.gmra.mxu2 %vm532_vm8, %v689_v55  ;;  %935 = vmatpush.msrb.mxu3 %v908_v42 }
 0x50f   : > { %936 = vmatpush.msrb.mxu3 %v907_v43 }
 0x57d   : > { %v765_v56 = vpop.f32.mrf.mxu3 }
 0x57e   : > { %799 = vrot.lane.b32.xlu1 %v765_v56, %s2377_s12  ;;  %v713_v1 = vpop.f32.mrf.mxu1  ;;  %s2386_s12 = smov 120  }
 0x588   : > { %v739_v57 = vpop.f32.mrf.mxu2 }
 0x589   : > { %795 = vrot.lane.b32.xlu0 %v739_v57, %s2378_s13  ;;  %v1701_v57 = vld [vmem:[%s2369_s10 + $0x7] ss:$0 sm:$0xff]  ;;  %s2387_s13 = smov 96  }
 0x590   : > { %v791_v58 = vpop.f32.mrf.mxu2 }
 0x591   : > { %803 = vrot.lane.b32.xlu0 %v791_v58, %s2379_s26  ;;  %s2389_s26 = smov 8  }
 0x5f0   : > { %v800_v3 = vpop.permute.xlu1 %799 }
 0x5fb   : > { %v796_v0 = vpop.permute.xlu0 %795 }
 0x5fc   : > { %v806_v2 = vsel %vm532_vm8, %v713_v1, %v796_v0 }
 0x5fd   : > { %v808_v5 = vsel %vm807_vm9, %v806_v2, %v800_v3 }
 0x603   : > { %v804_v4 = vpop.permute.xlu0 %803 }
 0x604   : > { %v810_v6 = vsel %vm809_vm10, %v808_v5, %v804_v4  ;;  %v1596_v4 = vld [vmem:[%s2364_s5 + $0x38] sm:$0xff]  ;;  %v1595_v5 = vld [vmem:[%s2364_s5 + $0x30] sm:$0xff] }
 0x605   : > { %1590 = vmatmul.msk.f32.vlgmr.msra.gmra.mxu1 %vm456_vm3, %v810_v6  ;;  %992 = vmatpush.msrb.mxu0 %v1596_v4  ;;  %v1594_v6 = vld [vmem:[%s2364_s5 + $0x28] sm:$0xff] }
 0x607   : > { %993 = vmatpush.msrb.mxu0 %v1595_v5 }
 0x609   : > { %994 = vmatpush.msrb.mxu0 %v1594_v6 }
 0x682   : > { %v837_v8 = vpop.f32.mrf.mxu1 }
 0x683   : > { %v838_v9 = vadd.f32 %v1697_v7, %v837_v8  ;;  %v1593_v7 = vld [vmem:[%s2364_s5 + $0x20] sm:$0xff] }
 0x684   : > { %995 = vmatpush.msrb.mxu0 %v1593_v7 }
 0x685   : > { %v840_v10 = vadd.f32 %v838_v9, %v1999_v48  ;;  %v871_v48 = vld [vmem:[%s2366_s7 + $0x10] sm:$0xff] }
 0x686   : > { %891 = vmatpush.msra.mxu2 %v871_v48 }
 0x687   : > { %v843_v11 = vsel %vm456_vm3, %v840_v10, 0.0 }
 0x688   : > { %844 = vadd.xlane.f32.xlu1 %v843_v11  ;;  %892 = vmatpush.msra.mxu2 %v870_v18 }
 0x68a   : > { %893 = vmatpush.msra.mxu2 %v869_v19  ;;  %v1703_v19 = vld [vmem:[%s2369_s10 + $0x9] ss:$0 sm:$0xff] }
 0x6fb   : > { %v845_v12 = vpop.xlane.xlu1 %844 }
 0x6fc   : > { %v846_v13 = vmul.f32 %v845_v12, %v1976_v24 }
 0x6fe   : > { %v847_v14 = vsub.f32 %v840_v10, %v846_v13 }
 0x700   : > { %v848_v15 = vmul.f32 %v847_v14, %v847_v14 }
 0x702   : > { %v849_v16 = vsel %vm456_vm3, %v848_v15, 0.0 }
 0x703   : > { %850 = vadd.xlane.f32.xlu0 %v849_v16 }
 0x776   : > { %v851_v20 = vpop.xlane.xlu0 %850 }
 0x777   : > { %v852_v21 = vmul.f32 %v851_v20, %v1976_v24 }
 0x779   : > { %v853_v22 = vadd.f32 1e-12, %v852_v21 }
 0x77b   : > { %1732 = vrsqrt.f32 %v853_v22  ;;  %vm860_vm12 = vweird.f32 %v853_v22 }
 0x781   : > { %v1733_v23 = vpop.eup %1732 }
 0x782   : > { %v855_v25 = vmul.f32 %v1733_v23, %v853_v22  ;;  %vm861_vm11 = vweird.f32 %v1733_v23  ;;  %v1704_v22 = vld [vmem:[%s2369_s10 + $0xa] ss:$0 sm:$0xff] }
 0x783   : > { %vm862_vm13 = vmor %vm860_vm12, %vm861_vm11 }
 0x784   : > { %v856_v26 = vmul.f32 %v1733_v23, %v855_v25 }
 0x786   : > { %v857_v27 = vmul.f32 0.5, %v856_v26 }
 0x788   : > { %v858_v28 = vsub.f32 1.5, %v857_v27 }
 0x78a   : > { %v859_v29 = vmul.f32 %v1733_v23, %v858_v28 }
 0x78c   : > { %v863_v31 = vsel %vm862_vm13, %v1733_v23, %v859_v29 }
 0x78d   : > { %v864_v32 = vmul.f32 %v863_v31, %v847_v14 }
 0x78f   : > { %v866_v34 = vmul.f32 %v1698_v30, %v864_v32 }
 0x791   : > { %v868_v35 = vadd.f32 %v1699_v33, %v866_v34 }
 0x793   : > { %1591 = vmatmul.msk.f32.vlgmr.msra.gmra.mxu2 %vm456_vm3, %v868_v35 }
 0x816   : > { %v895_v45 = vpop.f32.mrf.mxu2 }
 0x817   : > { %v896_v46 = vadd.f32 %v1700_v44, %v895_v45 }
 0x819   : > { %v898_v47 = vmul.f32 %v896_v46, %v896_v46 }
 0x81b   : > { %v899_v49 = vmul.f32 %v898_v47, %v896_v46 }
 0x81d   : > { %v900_v50 = vmul.f32 0.044715, %v899_v49 }
 0x81f   : > { %v901_v51 = vadd.f32 %v900_v50, %v896_v46 }
 0x821   : > { %v902_v52 = vmul.f32 0.7978846, %v901_v51 }
 0x823   : > { %1734 = vtanh.f32 %v902_v52 }
 0x829   : > { %v1735_v53 = vpop.eup %1734 }
 0x82a   : > { %v904_v54 = vadd.f32 1.0, %v1735_v53 }
 0x82c   : > { %v905_v55 = vmul.f32 0.5, %v904_v54 }
 0x82e   : > { %v906_v56 = vmul.f32 %v905_v55, %v896_v46 }
 0x830   : > { %1592 = vmatmul.msk.f32.vlgmr.msrb.gmra.mxu3 %vm917_vm14, %v906_v56 }
 0x8b3   : > { %v938_v58 = vpop.f32.mrf.mxu3 }
 0x8b4   : > { %v939_v59 = vadd.f32 %v1701_v57, %v938_v58 }
 0x8b6   : > { %v941_v60 = vadd.f32 %v939_v59, %v868_v35 }
 0x8b8   : > { %v944_v61 = vsel %vm456_vm3, %v941_v60, 0.0 }
 0x8b9   : > { %945 = vadd.xlane.f32.xlu2 %v944_v61 }
 0x92c   : > { %v946_v62 = vpop.xlane.xlu2 %945 }
 0x92d   : > { %v947_v0 = vmul.f32 %v946_v62, %v1976_v24 }
 0x92f   : > { %v948_v1 = vsub.f32 %v941_v60, %v947_v0 }
 0x931   : > { %v949_v2 = vmul.f32 %v948_v1, %v948_v1 }
 0x933   : > { %v950_v3 = vsel %vm456_vm3, %v949_v2, 0.0 }
 0x934   : > { %951 = vadd.xlane.f32.xlu1 %v950_v3 }
 0x9a7   : > { %v952_v8 = vpop.xlane.xlu1 %951 }
 0x9a8   : > { %v953_v9 = vmul.f32 %v952_v8, %v1976_v24 }
 0x9aa   : > { %v954_v10 = vadd.f32 1e-12, %v953_v9 }
 0x9ac   : > { %1736 = vrsqrt.f32 %v954_v10  ;;  %vm961_vm0 = vweird.f32 %v954_v10 }
 0x9b2   : > { %v1737_v11 = vpop.eup %1736 }
 0x9b3   : > { %v956_v12 = vmul.f32 %v1737_v11, %v954_v10  ;;  %vm962_vm15 = vweird.f32 %v1737_v11 }
 0x9b4   : > { %vm963_vm1 = vmor %vm961_vm0, %vm962_vm15 }
 0x9b5   : > { %v957_v13 = vmul.f32 %v1737_v11, %v956_v12 }
 0x9b7   : > { %v958_v14 = vmul.f32 0.5, %v957_v13 }
 0x9b9   : > { %v959_v15 = vsub.f32 1.5, %v958_v14 }
 0x9bb   : > { %v960_v16 = vmul.f32 %v1737_v11, %v959_v15 }
 0x9bd   : > { %v964_v48 = vsel %vm963_vm1, %v1737_v11, %v960_v16 }
 0x9be   : > { %v965_v18 = vmul.f32 %v964_v48, %v948_v1 }
 0x9c0   : > { %v967_v20 = vmul.f32 %v1702_v17, %v965_v18 }
 0x9c2   : > { %v2158_v21 = vadd.f32 %v1703_v19, %v967_v20 }
 0x9c4   : > { %1597 = vmatmul.msk.f32.vlgmr.msrb.gmra.mxu0 %vm456_vm3, %v2158_v21 }
 0xa41   : > { %v997_v23 = vpop.f32.mrf.mxu0 }
 0xa42   : > { %v2165_v25 = vadd.f32 %v1704_v22, %v997_v23 }
 0xa44   : > { %1005 = vrot.lane.b32.xlu1 %v2165_v25, %s2384_s25  ;;  %1003 = vrot.lane.b32.xlu2 %v2165_v25, %s2385_s30  ;;  %s408_s25 = scalar_lea.vmem %s2361_s2, %s1951_s14 }
 0xa45   : > { %1001 = vrot.lane.b32.xlu0 %v2165_v25, %s2386_s12 }
 0xa4c   : > { %1007 = vrot.lane.b32.xlu2 %v2165_v25, %s2387_s13 }
 0xa9e   : > { %v2175_v26 = vpop.permute.xlu2 %1003 }
 0xaa6   : > { %v1008_v27 = vpop.permute.xlu2 %1007 }
 0xaa7   : > { %1598 = vmatpush.xpose.msk.msrb.mxu1 %vm532_vm8, %v1008_v27 }
 0xaaa   : > { %1599 = vmatmul.msk.f32.vlgmr.msrb.gmra.mxu1 %vm532_vm8, %v2165_v25 }
 0xab6   : > { %v2180_v28 = vpop.permute.xlu1 %1005 }
 0xab7   : > { %v1002_v29 = vpop.permute.xlu0 %1001  ;;  %1085 = vrot.lane.b32.xlu1 %v2180_v28, %s2387_s13  ;;  %v1688_v6 = vpack.i.bf16 %v2180_v28, %v2175_v26 }
 0xab8   : > { %1033 = vrot.lane.b32.xlu0 %v1002_v29, %s2387_s13 }
 0xac0   : > { %1059 = vrot.lane.b32.xlu0 %v2175_v26, %s2387_s13  ;;  %s1496_s13 = sshll.u32 %s1492_s16, 4  ;;  %s1497_s13 = int_to_ptr.hbm [resolvable:$true] %s1496_s13 }
 0xb27   : > { %v1030_v33 = vpop.f32.mrf.mxu1 }
 0xb28   : > { %v1111_v43 = vmul.f32 0.35355338, %v1030_v33 }
 0xb29   : > { %v1086_v30 = vpop.permute.xlu1 %1085 }
 0xb2a   : > { %v1034_v31 = vpop.permute.xlu0 %1033  ;;  %1604 = vmatpush.xpose.msk.msra.mxu1 %vm532_vm8, %v1086_v30  ;;  %v1115_v47 = vadd.f32 %v1111_v43, %v2036_v63  ;;  %v1611_v30 = vld [vmem:[%s2365_s6 + $0x28] sm:$0xff] }
 0xb2b   : > { %1600 = vmatpush.xpose.msk.msrb.mxu2 %vm532_vm8, %v1034_v31  ;;  %v1610_v31 = vld [vmem:[%s2365_s6 + $0x20] sm:$0xff] }
 0xb2c   : > { %v1119_v49 = vsel %vm532_vm8, %v1115_v47, -inf }
 0xb2d   : > { %1605 = vmatmul.msk.f32.vlgmr.msra.gmra.mxu1 %vm532_vm8, %v2180_v28  ;;  %v1613_v28 = vld [vmem:[%s2365_s6 + $0x38] sm:$0xff] }
 0xb2e   : > { %1601 = vmatmul.msk.f32.vlgmr.msrb.gmra.mxu2 %vm532_vm8, %v1002_v29 }
 0xb32   : > { %v1060_v32 = vpop.permute.xlu0 %1059 }
 0xb33   : > { %1602 = vmatpush.xpose.msk.msra.mxu0 %vm532_vm8, %v1060_v32 }
 0xb36   : > { %1603 = vmatmul.msk.f32.vlgmr.msra.gmra.mxu0 %vm532_vm8, %v2175_v26 }
 0xbaa   : > { %v1108_v34 = vpop.f32.mrf.mxu1 }
 0xbab   : > { %v1114_v35 = vmul.f32 0.35355338, %v1108_v34 }
 0xbad   : > { %v1118_v36 = vadd.f32 %v1114_v35, %v2036_v63 }
 0xbaf   : > { %v1128_v37 = vsel %vm532_vm8, %v1118_v36, -inf }
 0xbb0   : > { %1129 = vmax.xlane.f32.xlu1 %v1128_v37 }
 0xbb1   : > { %v1056_v38 = vpop.f32.mrf.mxu2 }
 0xbb2   : > { %v1112_v39 = vmul.f32 0.35355338, %v1056_v38 }
 0xbb3   : > { %v1082_v40 = vpop.f32.mrf.mxu0 }
 0xbb4   : > { %v1113_v41 = vmul.f32 0.35355338, %v1082_v40  ;;  %v1116_v42 = vadd.f32 %v1112_v39, %v2036_v63  ;;  %v1705_v39 = vld [vmem:[%s2369_s10 + $0xb] ss:$0 sm:$0xff] }
 0xbb6   : > { %v1122_v44 = vsel %vm532_vm8, %v1116_v42, -inf  ;;  %v1117_v45 = vadd.f32 %v1113_v41, %v2036_v63 }
 0xbb7   : > { %1123 = vmax.xlane.f32.xlu2 %v1122_v44 }
 0xbb8   : > { %v1125_v46 = vsel %vm532_vm8, %v1117_v45, -inf }
 0xbb9   : > { %1126 = vmax.xlane.f32.xlu0 %v1125_v46 }
 0xbbf   : > { %1120 = vmax.xlane.f32.xlu2 %v1119_v49 }
 0xc23   : > { %v1130_v50 = vpop.xlane.xlu1 %1129 }
 0xc24   : > { %v1134_v51 = vsub.f32 %v1118_v36, %v1130_v50  ;;  %v1618_v50 = vld [vmem:[%s2366_s7 + $0x38] sm:$0xff] }
 0xc26   : > { %v1141_v52 = vmul.f32 1.442695, %v1134_v51  ;;  %v1616_v51 = vld [vmem:[%s2366_s7 + $0x28] sm:$0xff] }
 0xc28   : > { %1738 = vpow2.f32 %v1141_v52  ;;  %v1615_v52 = vld [vmem:[%s2366_s7 + $0x20] sm:$0xff] }
 0xc2a   : > { %v1124_v53 = vpop.xlane.xlu2 %1123 }
 0xc2b   : > { %v1132_v54 = vsub.f32 %v1116_v42, %v1124_v53 }
 0xc2c   : > { %v1127_v55 = vpop.xlane.xlu0 %1126 }
 0xc2d   : > { %v1137_v56 = vmul.f32 1.442695, %v1132_v54  ;;  %v1133_v57 = vsub.f32 %v1117_v45, %v1127_v55 }
 0xc2e   : > { %v1739_v58 = vpop.eup %1738 }
 0xc2f   : > { %1740 = vpow2.f32 %v1137_v56  ;;  %v1139_v59 = vmul.f32 1.442695, %v1133_v57  ;;  %v1152_v60 = vsel %vm532_vm8, %v1739_v58, 0.0 }
 0xc30   : > { %1153 = vadd.xlane.f32.xlu2 %v1152_v60 }
 0xc31   : > { %1742 = vpow2.f32 %v1139_v59 }
 0xc32   : > { %v1121_v63 = vpop.xlane.xlu2 %1120 }
 0xc33   : > { %v1131_v61 = vsub.f32 %v1115_v47, %v1121_v63 }
 0xc35   : > { %v1741_v62 = vpop.eup %1740  ;;  %v1135_v0 = vmul.f32 1.442695, %v1131_v61  ;;  %v1706_v61 = vld [vmem:[%s2369_s10 + $0xc] ss:$0 sm:$0xff] }
 0xc36   : > { %v1146_v1 = vsel %vm532_vm8, %v1741_v62, 0.0 }
 0xc37   : > { %v1743_v2 = vpop.eup %1742  ;;  %1744 = vpow2.f32 %v1135_v0  ;;  %1147 = vadd.xlane.f32.xlu0 %v1146_v1  ;;  %v1707_v1 = vld [vmem:[%s2369_s10 + $0xd] ss:$0 sm:$0xff] }
 0xc38   : > { %v1149_v3 = vsel %vm532_vm8, %v1743_v2, 0.0 }
 0xc39   : > { %1150 = vadd.xlane.f32.xlu1 %v1149_v3 }
 0xc3d   : > { %v1745_v4 = vpop.eup %1744 }
 0xc3e   : > { %v1143_v5 = vsel %vm532_vm8, %v1745_v4, 0.0 }
 0xc3f   : > { %1144 = vadd.xlane.f32.xlu2 %v1143_v5  ;;  %v1626_v5 = vld [vmem:[%s2367_s8 + $0x70] sm:$0xff] }
 0xc4b   : > { %1189 = vrot.lane.b32.xlu0 %v1002_v29, %s2388_s24  ;;  %v1612_v29 = vld [vmem:[%s2365_s6 + $0x30] sm:$0xff] }
 0xc52   : > { %1689 = vrot.lane.b32.xlu1 %v1688_v6, %s2388_s24  ;;  %v1625_v6 = vld [vmem:[%s2367_s8 + $0x68] sm:$0xff] }
 0xc57   : > { %1163 = vrot.lane.b32.xlu2 %v2165_v25, %s2388_s24 }
 0xca3   : > { %v1154_v7 = vpop.xlane.xlu2 %1153 }
 0xcaa   : > { %v1148_v8 = vpop.xlane.xlu0 %1147 }
 0xcac   : > { %v1151_v12 = vpop.xlane.xlu1 %1150 }
 0xcb2   : > { %v1145_v9 = vpop.xlane.xlu2 %1144 }
 0xcb3   : > { %1746 = vrcp.f32 %v1145_v9  ;;  %v1622_v9 = vld [vmem:[%s2367_s8 + $0x50] sm:$0xff] }
 0xcb4   : > { %1748 = vrcp.f32 %v1148_v8  ;;  %v1623_v8 = vld [vmem:[%s2367_s8 + $0x58] sm:$0xff] }
 0xcb5   : > { %1750 = vrcp.f32 %v1154_v7  ;;  %v1624_v7 = vld [vmem:[%s2367_s8 + $0x60] sm:$0xff] }
 0xcb6   : > { %1752 = vrcp.f32 %v1151_v12  ;;  %v1708_v12 = vld [vmem:[%s2369_s10 + $0xe] ss:$0 sm:$0xff] }
 0xcb9   : > { %v1747_v10 = vpop.eup %1746 }
 0xcba   : > { %v1749_v11 = vpop.eup %1748  ;;  %v1159_v13 = vmul.f32 %v1747_v10, %v1745_v4  ;;  %v1164_v14 = vpop.permute.xlu2 %1163  ;;  %v1627_v4 = vld [vmem:[%s2367_s8 + $0x78] sm:$0xff]  ;;  %v1621_v10 = vld [vmem:[%s2367_s8 + $0x48] sm:$0xff] }
 0xcbb   : > { %1184 = vmatpush.msra.mxu2 %v1164_v14  ;;  %v1160_v15 = vmul.f32 %v1749_v11, %v1741_v62  ;;  %v1751_v17 = vpop.eup %1750  ;;  %v1620_v11 = vld [vmem:[%s2367_s8 + $0x40] sm:$0xff] }
 0xcbc   : > { %1606 = vmatmul.msk.f32.vlgmr.msra.gmra.mxu2 %vm532_vm8, %v1159_v13  ;;  %v1753_v48 = vpop.eup %1752  ;;  %v1162_v22 = vmul.f32 %v1751_v17, %v1739_v58 }
 0xcbd   : > { %v1190_v16 = vpop.permute.xlu0 %1189  ;;  %v1161_v23 = vmul.f32 %v1753_v48, %v1743_v2  ;;  %1304 = vmatpush.msrb.mxu2 %v1613_v28 }
 0xcbe   : > { %1210 = vmatpush.msra.mxu3 %v1190_v16 }
 0xcbf   : > { %1607 = vmatmul.msk.f32.vlgmr.msra.gmra.mxu3 %vm532_vm8, %v1160_v15  ;;  %1305 = vmatpush.msrb.mxu2 %v1612_v29 }
 0xcc0   : > { %1363 = vmatpush.msrb.mxu3 %v1618_v50  ;;  %v1710_v50 = vld [vmem:[%s2369_s10 + $0x10] ss:$0 sm:$0xff] }
 0xcc1   : > { %1306 = vmatpush.msrb.mxu2 %v1611_v30 }
 0xcc3   : > { %1307 = vmatpush.msrb.mxu2 %v1610_v31 }
 0xcc4   : > { %v1690_v18 = vpop.permute.xlu1 %1689 }
 0xcc5   : > { %v1692_v19 = vunpack.i.h.bf16 %v1690_v18  ;;  %v1691_v20 = vunpack.i.l.bf16 %v1690_v18 }
 0xcc7   : > { %1236 = vmatpush.msrb.mxu0 %v1691_v20  ;;  %1262 = vmatpush.msrb.mxu1 %v1692_v19 }
 0xcc8   : > { %1608 = vmatmul.msk.f32.vlgmr.msrb.gmra.mxu0 %vm532_vm8, %v1161_v23  ;;  %1609 = vmatmul.msk.f32.vlgmr.msrb.gmra.mxu1 %vm532_vm8, %v1162_v22 }
 0xcc9   : > { %1402 = vmatpush.msra.mxu0 %v1627_v4 }
 0xccb   : > { %1403 = vmatpush.msra.mxu0 %v1626_v5 }
 0xccd   : > { %1404 = vmatpush.msra.mxu0 %v1625_v6 }
 0xccf   : > { %1405 = vmatpush.msra.mxu0 %v1624_v7 }
 0xcd1   : > { %1406 = vmatpush.msra.mxu0 %v1623_v8 }
 0xcd3   : > { %1407 = vmatpush.msra.mxu0 %v1622_v9 }
 0xcd5   : > { %1408 = vmatpush.msra.mxu0 %v1621_v10 }
 0xcd7   : > { %1409 = vmatpush.msra.mxu0 %v1620_v11 }
 0xd3f   : > { %v1186_v33 = vpop.f32.mrf.mxu2 }
 0xd42   : > { %v1212_v25 = vpop.f32.mrf.mxu3 }
 0xd43   : > { %1268 = vrot.lane.b32.xlu0 %v1212_v25, %s2389_s26  ;;  %v1709_v25 = vld [vmem:[%s2369_s10 + $0xf] ss:$0 sm:$0xff]  ;;  %s1774_s26 = sshra.s32 %s1497_s13, 4  ;;  %s1775_s26 = int_to_ptr.hbm [resolvable:$true] %s1774_s26 }
 0xd44   : > { %p1781_p0 = scmp.lt.s32.totalorder %s1775_s26, %s2370_s11 }
 0xd45   : > { %v1264_v26 = vpop.f32.mrf.mxu1  ;;  %v1238_v27 = vpop.f32.mrf.mxu0 }
 0xd46   : > { %1276 = vrot.lane.b32.xlu1 %v1264_v26, %s2390_s22  ;;  %s397_s22 = sand.u32 1, %s1814_s18  }
 0xd47   : > { %s398_s14 = scalar_lea.vmem [#allocation2], %s397_s22  ;;  %s1484_s24 = scalar_lea.sflag [#allocation3], %s397_s22 }
 0xd48   : > { %s1494_s12 = sshll.u32 %s398_s14, 4  ;;  %s1495_s12 = int_to_ptr.vmem [resolvable:$true] %s1494_s12 }
 0xd4b   : > { %1272 = vrot.lane.b32.xlu0 %v1238_v27, %s2391_s29  ;;  %s1776_s29 = scalar_lea.hbm %s1775_s26, 1 }
 0xd4c   : > { %p1777_p11 = scmp.ne.s32.totalorder %s1775_s26, %s1776_s29 }
 0xd4e   : > { %p1778_p12 = pnand %p1777_p11, %p1933_p5 }
 0xd50   : > { %p1779_p13 = pneg %p1778_p12 }
 0xdb5   : > { %v1269_v32 = vpop.permute.xlu0 %1268 }
 0xdb6   : > { %v1279_v34 = vsel %vm532_vm8, %v1186_v33, %v1269_v32 }
 0xdb8   : > { %v1277_v36 = vpop.permute.xlu1 %1276 }
 0xdbd   : > { %v1273_v35 = vpop.permute.xlu0 %1272 }
 0xdbe   : > { %v1280_v37 = vsel %vm807_vm9, %v1279_v34, %v1273_v35  ;;  %v1447_v35 = vld [vmem:[%s2368_s9 + $0x18] sm:$0xff] }
 0xdbf   : > { %v1281_v38 = vsel %vm809_vm10, %v1280_v37, %v1277_v36  ;;  %1471 = vmatpush.msra.mxu1 %v1447_v35  ;;  %v1446_v36 = vld [vmem:[%s2368_s9 + $0x10] sm:$0xff]  ;;  %v1445_v37 = vld [vmem:[%s2368_s9 + $0x8] sm:$0xff] }
 0xdc0   : > { %1614 = vmatmul.msk.f32.vlgmr.msrb.gmra.mxu2 %vm456_vm3, %v1281_v38  ;;  %v1444_v38 = vld [vmem:[%s2368_s9] sm:$0xff] }
 0xdc1   : > { %1472 = vmatpush.msra.mxu1 %v1446_v36 }
 0xdc3   : > { %1473 = vmatpush.msra.mxu1 %v1445_v37 }
 0xdc5   : > { %1474 = vmatpush.msra.mxu1 %v1444_v38 }
 0xe43   : > { %v1309_v40 = vpop.f32.mrf.mxu2 }
 0xe44   : > { %v1310_v41 = vadd.f32 %v1705_v39, %v1309_v40  ;;  %v1443_v39 = vld [vmem:[%s408_s25] sm:$0x1]  ;;  %s1780_s25 = scalar_lea.hbm %s2370_s11, 2 }
 0xe45   : > { %p1782_p1 = scmp.lt.s32.totalorder %s1780_s25, %s1776_s29 }
 0xe46   : > { %v1312_v42 = vadd.f32 %v1310_v41, %v2158_v21  ;;  %v1617_v21 = vld [vmem:[%s2366_s7 + $0x30] sm:$0xff] }
 0xe47   : > { %1364 = vmatpush.msrb.mxu3 %v1617_v21  ;;  %p1783_p2 = por %p1782_p1, %p1781_p0 }
 0xe48   : > { %v1315_v43 = vsel %vm456_vm3, %v1312_v42, 0.0 }
 0xe49   : > { %1316 = vadd.xlane.f32.xlu0 %v1315_v43  ;;  %1365 = vmatpush.msrb.mxu3 %v1616_v51  ;;  %p1784_p3 = pnand %p1783_p2, %p1779_p13 }
 0xe4b   : > { %1366 = vmatpush.msrb.mxu3 %v1615_v52 }
 0xebc   : > { %v1317_v44 = vpop.xlane.xlu0 %1316 }
 0xebd   : > { %v1318_v45 = vmul.f32 %v1317_v44, %v1976_v24 }
 0xebf   : > { %v1319_v46 = vsub.f32 %v1312_v42, %v1318_v45 }
 0xec1   : > { %v1320_v47 = vmul.f32 %v1319_v46, %v1319_v46 }
 0xec3   : > { %v1321_v49 = vsel %vm456_vm3, %v1320_v47, 0.0 }
 0xec4   : > { %1322 = vadd.xlane.f32.xlu1 %v1321_v49 }
 0xedd   : > { %1451 = vperm.xlu1 %1693, %v1443_v39  }
 0xf37   : > { %v1323_v53 = vpop.xlane.xlu1 %1322 }
 0xf38   : > { %v1324_v54 = vmul.f32 %v1323_v53, %v1976_v24 }
 0xf3a   : > { %v1325_v55 = vadd.f32 1e-12, %v1324_v54 }
 0xf3c   : > { %1754 = vrsqrt.f32 %v1325_v55  ;;  %vm1332_vm4 = vweird.f32 %v1325_v55 }
 0xf42   : > { %v1755_v56 = vpop.eup %1754 }
 0xf43   : > { %v1327_v57 = vmul.f32 %v1755_v56, %v1325_v55  ;;  %vm1333_vm2 = vweird.f32 %v1755_v56 }
 0xf44   : > { %vm1334_vm5 = vmor %vm1332_vm4, %vm1333_vm2 }
 0xf45   : > { %v1328_v58 = vmul.f32 %v1755_v56, %v1327_v57 }
 0xf47   : > { %v1329_v59 = vmul.f32 0.5, %v1328_v58 }
 0xf49   : > { %v1330_v60 = vsub.f32 1.5, %v1329_v59  ;;  %v1479_v59 = vld [vmem:[%s2369_s10 + $0x13] sm:$0x1] }
 0xf4b   : > { %v1331_v63 = vmul.f32 %v1755_v56, %v1330_v60 }
 0xf4d   : > { %v1335_v62 = vsel %vm1334_vm5, %v1755_v56, %v1331_v63  ;;  %v1448_v56 = vld [vmem:[%s2369_s10 + $0x12] sm:$0x1] }
 0xf4e   : > { %v1336_v0 = vmul.f32 %v1335_v62, %v1319_v46 }
 0xf4f   : > { %v1452_v54 = vpop.permute.xlu1 %1451 }
 0xf50   : > { %v1338_v2 = vmul.f32 %v1706_v61, %v1336_v0  ;;  %v1454_v55 = vperm.slane %v1452_v54, 0 }
 0xf52   : > { %v1340_v3 = vadd.f32 %v1707_v1, %v1338_v2  ;;  %v1455_v57 = vmul.f32 %v1454_v55, %v1448_v56 }
 0xf54   : > { %1619 = vmatmul.msk.f32.vlgmr.msrb.gmra.mxu3 %vm456_vm3, %v1340_v3 }
 0xfd7   : > { %v1368_v13 = vpop.f32.mrf.mxu3 }
 0xfd8   : > { %v1369_v14 = vadd.f32 %v1708_v12, %v1368_v13 }
 0xfda   : > { %v1371_v15 = vmul.f32 %v1369_v14, %v1369_v14 }
 0xfdc   : > { %v1372_v16 = vmul.f32 %v1371_v15, %v1369_v14 }
 0xfde   : > { %v1373_v17 = vmul.f32 0.044715, %v1372_v16 }
 0xfe0   : > { %v1374_v48 = vadd.f32 %v1373_v17, %v1369_v14 }
 0xfe2   : > { %v1375_v18 = vmul.f32 0.7978846, %v1374_v48 }
 0xfe4   : > { %1756 = vtanh.f32 %v1375_v18 }
 0xfea   : > { %v1757_v19 = vpop.eup %1756 }
 0xfeb   : > { %v1377_v20 = vadd.f32 1.0, %v1757_v19 }
 0xfed   : > { %v1378_v22 = vmul.f32 0.5, %v1377_v20 }
 0xfef   : > { %v1379_v23 = vmul.f32 %v1378_v22, %v1369_v14 }
 0xff1   : > { %1628 = vmatmul.msk.f32.vlgmr.msra.gmra.mxu0 %vm917_vm14, %v1379_v23 }
0x106e   : > { %v1411_v26 = vpop.f32.mrf.mxu0 }
0x106f   : > { %v1412_v27 = vadd.f32 %v1709_v25, %v1411_v26 }
0x1071   : > { %v1414_v28 = vadd.f32 %v1412_v27, %v1340_v3 }
0x1073   : > { %v1417_v29 = vsel %vm456_vm3, %v1414_v28, 0.0 }
0x1074   : > { %1418 = vadd.xlane.f32.xlu2 %v1417_v29 }
0x10e7   : > { %v1419_v30 = vpop.xlane.xlu2 %1418 }
0x10e8   : > { %v1420_v31 = vmul.f32 %v1419_v30, %v1976_v24 }
0x10ea   : > { %v1421_v32 = vsub.f32 %v1414_v28, %v1420_v31 }
0x10ec   : > { %v1422_v33 = vmul.f32 %v1421_v32, %v1421_v32 }
0x10ee   : > { %v1423_v34 = vsel %vm456_vm3, %v1422_v33, 0.0 }
0x10ef   : > { %1424 = vadd.xlane.f32.xlu0 %v1423_v34 }
0x1162   : > { %v1425_v40 = vpop.xlane.xlu0 %1424 }
0x1163   : > { %v1426_v41 = vmul.f32 %v1425_v40, %v1976_v24  ;;  %v1711_v24 = vld [vmem:[%s2369_s10 + $0x11] ss:$0 sm:$0xff] }
0x1165   : > { %v1427_v42 = vadd.f32 1e-12, %v1426_v41 }
0x1167   : > { %1758 = vrsqrt.f32 %v1427_v42  ;;  %vm1434_vm7 = vweird.f32 %v1427_v42 }
0x116d   : > { %v1759_v43 = vpop.eup %1758 }
0x116e   : > { %v1429_v44 = vmul.f32 %v1759_v43, %v1427_v42  ;;  %vm1435_vm6 = vweird.f32 %v1759_v43 }
0x116f   : > { %vm1436_vm8 = vmor %vm1434_vm7, %vm1435_vm6 }
0x1170   : > { %v1430_v45 = vmul.f32 %v1759_v43, %v1429_v44 }
0x1172   : > { %v1431_v46 = vmul.f32 0.5, %v1430_v45 }
0x1174   : > { %v1432_v47 = vsub.f32 1.5, %v1431_v46 }
0x1176   : > { %v1433_v49 = vmul.f32 %v1759_v43, %v1432_v47 }
0x1178   : > { %v1437_v21 = vsel %vm1436_vm8, %v1759_v43, %v1433_v49 }
0x1179   : > { %v1438_v51 = vmul.f32 %v1437_v21, %v1421_v32 }
0x117b   : > { %v1440_v52 = vmul.f32 %v1710_v50, %v1438_v51 }
0x117d   : > { %v1442_v53 = vadd.f32 %v1711_v24, %v1440_v52 }
0x117f   : > { %1629 = vmatmul.msk.f32.vlgmr.msra.gmra.mxu1 %vm456_vm3, %v1442_v53  ;;  %vm1481_vm3 = vcmask 8192  }
0x11fc   : > { %v1476_v58 = vpop.f32.mrf.mxu1 }
0x11fd   : > { %v1477_v60 = vadd.f32 %v1476_v58, %v1455_v57 }
0x11ff   : > { %v1480_v63 = vadd.f32 %v1479_v59, %v1477_v60 }
0x1201   : > { %1482 = vst.msk [vmem:[%s398_s14] sm:$0x1] %vm1481_vm3, %v1480_v63 }
0x1202   : > { %1787 = shalt.err (!%p1784_p3)
}
0x1203   : > { %1632 = dma.vmem_to_hbm [thread:$0]  (%p1933_p5), %s1495_s12, 16, %s1497_s13, %s1484_s24  }
0x1204 PF: > { %p1638_p4 = scmp.ge.s32.totalorder %s1822_s20, 2  ;;  %s1508_s22 = sand.u32 1, %s1810_s17  }
0x1205   : > { %s1509_s14 = scalar_lea.sflag [#allocation3], %s1508_s22 }
0x1206   : > { %p1635_p7 = pnand %p1638_p4, %p1937_p6 }
0x1208   : > { %p1636_p8 = pneg %p1635_p7 }
0x120a   : > { %1805 = dma.done.wait (%p1636_p8), %s1509_s14, 16  }
0x120b   : > { %1807 = vsyncadd (%p1636_p8), %s1509_s14, 4294967280  ;;  %s2392_s26 = sld [smem:[#allocation5_spill]]  ;;  %p21_p9 = scmp.ge.s32.totalorder %s1920_s23, 4  }
0x120c   : > { %s2393_s17 = smov %s1814_s18  ;;  %s2394_s18 = smov %s1818_s19 }
0x120d   : > { %s2396_s20 = smov %s1920_s23  ;;  %23 = sbr.rel (!%p21_p9) target bundleno = 3 (0x3), region = 109 }
0x1211   : > { %s2395_s19 = smov %s2392_s26 }
0x1212   :  { %1514 = vsyncpa [#allocation3], 1 }
0x1213   :  { %1516 = vsyncpa [#allocation3 + $0x1], 1 }

</bundles_post_ra>
